<compile_context>
chip_gen: v6e
topology: v6e:2x2x1
jax: 0.10.0
libtpu: 0.0.40
codegen_flags: <defaults>
</compile_context>

<pallas_src>
import functools
import numpy as np
import jax
import jax.numpy as jnp
from jax.experimental import pallas as pl
from jax.experimental.pallas import tpu as pltpu

NEG_INF = -1e30  # additive causal mask value (same softmax result as -inf)
LN_EPS = 1e-5


# ----------------------------- in-kernel helpers -----------------------------

def _layer_norm(x, gamma, beta, eps):
    mu = jnp.mean(x, axis=-1, keepdims=True)
    var = jnp.mean((x - mu) ** 2, axis=-1, keepdims=True)
    return (x - mu) * jax.lax.rsqrt(var + eps) * gamma + beta


# ----------------------------- fused Pallas kernel ----------------------------

def bert_kernel(x_ref, pe_ref,
                wqkv_ref, bqkv_ref, wo_ref, bo_ref,
                ln1g_ref, ln1b_ref,
                w1_ref, b1_ref, w2_ref, b2_ref,
                ln2g_ref, ln2b_ref,
                fng_ref, fnb_ref,
                o_ref, x_sc, *, nhead, eps):
    """grid = (batch, nlayers).  One batch element per 'parallel' step; the layer
    axis is 'arbitrary' and the activation is carried in VMEM scratch across it."""
    l = pl.program_id(1)
    nlayers = pl.num_programs(1)
    bf16 = jnp.bfloat16

    # ---- load activation + positional encoding once per batch element ----
    @pl.when(l == 0)
    def _():
        x_sc[...] = x_ref[0] + pe_ref[...]

    x = x_sc[...]                                   # (S, D) f32, VMEM-resident
    S, D = x.shape
    dh = D // nhead
    scale = 1.0 / float(np.sqrt(dh))

    # ---- QKV projection (bf16 operands on the MXU, f32 accumulation) ----
    qkv = jnp.dot(x.astype(bf16), wqkv_ref[0],
                  preferred_element_type=jnp.float32) + bqkv_ref[0]
    q = qkv[:, 0 * D:1 * D] * scale                 # fold 1/sqrt(dh) into q (S*D work)
    k = qkv[:, 1 * D:2 * D]
    v = qkv[:, 2 * D:3 * D]

    # ---- causal additive mask generated in-kernel (no (S,S) HBM traffic) ----
    row = jax.lax.broadcasted_iota(jnp.int32, (S, S), 0)
    col = jax.lax.broadcasted_iota(jnp.int32, (S, S), 1)
    mask = jnp.where(col > row, NEG_INF, 0.0).astype(jnp.float32)

    # ---- attention: per-head, accumulated through the output projection ----
    wo = wo_ref[0]                                  # (D, D) bf16
    attn = jnp.zeros((S, D), jnp.float32)
    for h in range(nhead):                          # static unroll over heads
        qh = q[:, h * dh:(h + 1) * dh].astype(bf16)
        kh = k[:, h * dh:(h + 1) * dh].astype(bf16)
        vh = v[:, h * dh:(h + 1) * dh].astype(bf16)
        s = jnp.dot(qh, kh.T, preferred_element_type=jnp.float32) + mask
        s = s - jnp.max(s, axis=-1, keepdims=True)
        p = jnp.exp(s)                              # f32 softmax numerics
        p = p * pl.reciprocal(jnp.sum(p, axis=-1, keepdims=True), approx=True)
        pv = jnp.dot(p.astype(bf16), vh, preferred_element_type=jnp.float32)
        attn += jnp.dot(pv.astype(bf16), wo[h * dh:(h + 1) * dh, :],
                        preferred_element_type=jnp.float32)
    attn = attn + bo_ref[0]

    # ---- residual + LayerNorm 1 (f32) ----
    y = _layer_norm(x + attn, ln1g_ref[0], ln1b_ref[0], eps)

    # ---- feed-forward (bf16 matmuls, ReLU / bias in f32) ----
    ff = jnp.dot(y.astype(bf16), w1_ref[0],
                 preferred_element_type=jnp.float32) + b1_ref[0]
    ff = jnp.maximum(ff, 0.0)
    ff = jnp.dot(ff.astype(bf16), w2_ref[0],
                 preferred_element_type=jnp.float32) + b2_ref[0]

    # ---- residual + LayerNorm 2; keep activation resident for next layer ----
    z = _layer_norm(y + ff, ln2g_ref[0], ln2b_ref[0], eps)
    x_sc[...] = z

    # ---- final encoder LayerNorm + single writeback on the last layer ----
    @pl.when(l == nlayers - 1)
    def _():
        o_ref[0] = _layer_norm(z, fng_ref[...], fnb_ref[...], eps)


# ----------------------------- wrapper -----------------------------------------

def _layer_spec(shape):
    """BlockSpec that selects the current layer's slice of a [nlayers, ...] array."""
    nrest = len(shape) - 1
    return pl.BlockSpec((1,) + tuple(shape[1:]),
                        lambda b, l, _n=nrest: (l,) + (0,) * _n)


def _const_spec(shape):
    """Whole-array block, constant block index (DMA'd once, stays resident)."""
    n = len(shape)
    return pl.BlockSpec(tuple(shape), lambda b, l, _n=n: (0,) * _n)


def bert_forward(src, stacked, final_norm, nhead, eps=LN_EPS):
    B, S, D = src.shape
    nlayers = stacked["wqkv"].shape[0]
    pe = positional_encoding(S, D)

    weight_order = ("wqkv", "bqkv", "wo", "bo", "ln1g", "ln1b",
                    "w1", "b1", "w2", "b2", "ln2g", "ln2b")
    weights = tuple(stacked[k] for k in weight_order)

    in_specs = ([pl.BlockSpec((1, S, D), lambda b, l: (b, 0, 0)),   # src
                 _const_spec(pe.shape)]                             # positional encoding
                + [_layer_spec(w.shape) for w in weights]
                + [_const_spec(final_norm["g"].shape),
                   _const_spec(final_norm["b"].shape)])

    return pl.pallas_call(
        functools.partial(bert_kernel, nhead=nhead, eps=eps),
        out_shape=jax.ShapeDtypeStruct((B, S, D), jnp.float32),
        grid=(B, nlayers),
        in_specs=in_specs,
        out_specs=pl.BlockSpec((1, S, D), lambda b, l: (b, 0, 0)),
        scratch_shapes=[pltpu.VMEM((S, D), jnp.float32)],
        compiler_params=pltpu.CompilerParams(
            dimension_semantics=("parallel", "arbitrary")),
    )(src, pe, *weights, final_norm["g"], final_norm["b"])


# ----------------------------- glue (host-side constants) ----------------------

def positional_encoding(seq_len, d_model):
    position = np.arange(seq_len, dtype=np.float32)[:, None]
    div_term = np.exp(np.arange(0, d_model, 2, dtype=np.float32)
                      * (-np.log(10000.0) / d_model))
    pe = np.zeros((seq_len, d_model), dtype=np.float32)
    pe[:, 0::2] = np.sin(position * div_term)
    pe[:, 1::2] = np.cos(position * div_term)
    return jnp.asarray(pe)


def init_params(key, d_model, d_hid, nlayers):
    wqkv, wo, w1, w2 = [], [], [], []
    for _ in range(nlayers):
        key, k0, k1, k2, k3 = jax.random.split(key, 5)
        wqkv.append(0.02 * jax.random.normal(k0, (d_model, 3 * d_model), jnp.float32))
        wo.append(0.02 * jax.random.normal(k1, (d_model, d_model), jnp.float32))
        w1.append(0.02 * jax.random.normal(k2, (d_model, d_hid), jnp.float32))
        w2.append(0.02 * jax.random.normal(k3, (d_hid, d_model), jnp.float32))
    stacked = dict(
        # matmul weights stored bf16 (halved DMA, native MXU rate); biases / LN f32
        wqkv=jnp.stack(wqkv).astype(jnp.bfloat16),
        bqkv=jnp.zeros((nlayers, 1, 3 * d_model), jnp.float32),
        wo=jnp.stack(wo).astype(jnp.bfloat16),
        bo=jnp.zeros((nlayers, 1, d_model), jnp.float32),
        ln1g=jnp.ones((nlayers, 1, d_model), jnp.float32),
        ln1b=jnp.zeros((nlayers, 1, d_model), jnp.float32),
        w1=jnp.stack(w1).astype(jnp.bfloat16),
        b1=jnp.zeros((nlayers, 1, d_hid), jnp.float32),
        w2=jnp.stack(w2).astype(jnp.bfloat16),
        b2=jnp.zeros((nlayers, 1, d_model), jnp.float32),
        ln2g=jnp.ones((nlayers, 1, d_model), jnp.float32),
        ln2b=jnp.zeros((nlayers, 1, d_model), jnp.float32),
    )
    final = dict(g=jnp.ones((1, d_model), jnp.float32),
                 b=jnp.zeros((1, d_model), jnp.float32))
    return stacked, final


# ----------------------------- pure-JAX reference ------------------------------

def ref_forward(src, stacked, final_norm, nhead, eps=LN_EPS):
    B, S, D = src.shape
    nlayers = stacked["wqkv"].shape[0]
    dh = D // nhead
    bf16 = jnp.bfloat16
    x = src + positional_encoding(S, D)[None]
    mask = jnp.triu(jnp.full((S, S), NEG_INF, jnp.float32), k=1)
    for l in range(nlayers):
        qkv = jnp.dot(x.astype(bf16), stacked["wqkv"][l],
                      preferred_element_type=jnp.float32) + stacked["bqkv"][l, 0]
        q, k, v = jnp.split(qkv, 3, axis=-1)
        q = (q * (1.0 / np.sqrt(dh))).reshape(B, S, nhead, dh).transpose(0, 2, 1, 3)
        k = k.reshape(B, S, nhead, dh).transpose(0, 2, 1, 3)
        v = v.reshape(B, S, nhead, dh).transpose(0, 2, 1, 3)
        s = jnp.einsum("bhqd,bhkd->bhqk", q.astype(bf16), k.astype(bf16),
                       preferred_element_type=jnp.float32) + mask
        p = jax.nn.softmax(s, axis=-1)
        a = jnp.einsum("bhqk,bhkd->bhqd", p.astype(bf16), v.astype(bf16),
                       preferred_element_type=jnp.float32)
        a = a.transpose(0, 2, 1, 3).reshape(B, S, D)
        a = jnp.dot(a.astype(bf16), stacked["wo"][l],
                    preferred_element_type=jnp.float32) + stacked["bo"][l, 0]
        y = _layer_norm(x + a, stacked["ln1g"][l, 0], stacked["ln1b"][l, 0], eps)
        f = jnp.dot(y.astype(bf16), stacked["w1"][l],
                    preferred_element_type=jnp.float32) + stacked["b1"][l, 0]
        f = jnp.maximum(f, 0.0)
        f = jnp.dot(f.astype(bf16), stacked["w2"][l],
                    preferred_element_type=jnp.float32) + stacked["b2"][l, 0]
        x = _layer_norm(y + f, stacked["ln2g"][l, 0], stacked["ln2b"][l, 0], eps)
    return _layer_norm(x, final_norm["g"][0], final_norm["b"][0], eps)


# ----------------------------- main --------------------------------------------

if __name__ == "__main__":
    d_model, nhead, d_hid, nlayers = 32, 4, 64, 2
    batch, seq = 2, 8

    key = jax.random.PRNGKey(0)
    key, pkey, xkey = jax.random.split(key, 3)
    stacked, final_norm = init_params(pkey, d_model, d_hid, nlayers)
    src = jax.random.normal(xkey, (batch, seq, d_model), jnp.float32)

    out = jax.block_until_ready(bert_forward(src, stacked, final_norm, nhead))
    ref = jax.block_until_ready(ref_forward(src, stacked, final_norm, nhead))

    np.testing.assert_allclose(np.asarray(out), np.asarray(ref), rtol=2e-2, atol=2e-2)
    assert out.shape == (batch, seq, d_model)

    print("KERNEL_OK")
</pallas_src>

<mosaic_0001>
module attributes {stable_mosaic.version = 11 : i64} {
  func.func @bert_kernel(%arg0: i32, %arg1: i32, %arg2: memref<1x8x32xf32, #tpu.memory_space<vmem>>, %arg3: memref<8x32xf32, #tpu.memory_space<vmem>>, %arg4: memref<1x32x96xbf16, #tpu.memory_space<vmem>>, %arg5: memref<1x1x96xf32, #tpu.memory_space<vmem>>, %arg6: memref<1x32x32xbf16, #tpu.memory_space<vmem>>, %arg7: memref<1x1x32xf32, #tpu.memory_space<vmem>>, %arg8: memref<1x1x32xf32, #tpu.memory_space<vmem>>, %arg9: memref<1x1x32xf32, #tpu.memory_space<vmem>>, %arg10: memref<1x32x64xbf16, #tpu.memory_space<vmem>>, %arg11: memref<1x1x64xf32, #tpu.memory_space<vmem>>, %arg12: memref<1x64x32xbf16, #tpu.memory_space<vmem>>, %arg13: memref<1x1x32xf32, #tpu.memory_space<vmem>>, %arg14: memref<1x1x32xf32, #tpu.memory_space<vmem>>, %arg15: memref<1x1x32xf32, #tpu.memory_space<vmem>>, %arg16: memref<1x32xf32, #tpu.memory_space<vmem>>, %arg17: memref<1x32xf32, #tpu.memory_space<vmem>>, %arg18: memref<1x8x32xf32, #tpu.memory_space<vmem>>, %arg19: memref<8x32xf32, #tpu.memory_space<vmem>>) attributes {dimension_semantics = [#tpu.dimension_semantics<parallel>, #tpu.dimension_semantics<arbitrary>], iteration_bounds = array<i64: 2, 2>, scalar_prefetch = 0 : i64, scratch_operands = 1 : i64, tpu.core_type = #tpu.core_type<tc>, window_params = [{transform_indices = @transform_0, window_bounds = array<i64: 1, 8, 32>}, {pipeline_mode = #tpu.pipeline_mode<synchronous>, transform_indices = @transform_1, window_bounds = array<i64: 8, 32>}, {transform_indices = @transform_2, window_bounds = array<i64: 1, 32, 96>}, {transform_indices = @transform_3, window_bounds = array<i64: 1, 1, 96>}, {transform_indices = @transform_4, window_bounds = array<i64: 1, 32, 32>}, {transform_indices = @transform_5, window_bounds = array<i64: 1, 1, 32>}, {transform_indices = @transform_6, window_bounds = array<i64: 1, 1, 32>}, {transform_indices = @transform_7, window_bounds = array<i64: 1, 1, 32>}, {transform_indices = @transform_8, window_bounds = array<i64: 1, 32, 64>}, {transform_indices = @transform_9, window_bounds = array<i64: 1, 1, 64>}, {transform_indices = @transform_10, window_bounds = array<i64: 1, 64, 32>}, {transform_indices = @transform_11, window_bounds = array<i64: 1, 1, 32>}, {transform_indices = @transform_12, window_bounds = array<i64: 1, 1, 32>}, {transform_indices = @transform_13, window_bounds = array<i64: 1, 1, 32>}, {pipeline_mode = #tpu.pipeline_mode<synchronous>, transform_indices = @transform_14, window_bounds = array<i64: 1, 32>}, {pipeline_mode = #tpu.pipeline_mode<synchronous>, transform_indices = @transform_15, window_bounds = array<i64: 1, 32>}, {transform_indices = @transform_16, window_bounds = array<i64: 1, 8, 32>}]} {
    %c0_i32 = arith.constant 0 : i32
    %0 = arith.cmpi eq, %arg1, %c0_i32 : i32
    %1 = arith.extui %0 : i1 to i32
    %c0_i32_0 = arith.constant 0 : i32
    %2 = arith.cmpi ne, %1, %c0_i32_0 : i32
    scf.if %2 {
      %c0_78 = arith.constant 0 : index
      %c0_79 = arith.constant 0 : index
      %c0_80 = arith.constant 0 : index
      %206 = vector.load %arg2[%c0_78, %c0_79, %c0_80] : memref<1x8x32xf32, #tpu.memory_space<vmem>>, vector<1x8x32xf32>
      %207 = vector.shape_cast %206 : vector<1x8x32xf32> to vector<8x32xf32>
      %c0_81 = arith.constant 0 : index
      %c0_82 = arith.constant 0 : index
      %208 = vector.load %arg3[%c0_81, %c0_82] : memref<8x32xf32, #tpu.memory_space<vmem>>, vector<8x32xf32>
      %209 = arith.addf %207, %208 : vector<8x32xf32>
      %c0_83 = arith.constant 0 : index
      %c0_84 = arith.constant 0 : index
      %210 = vector.load %arg19[%c0_83, %c0_84] : memref<8x32xf32, #tpu.memory_space<vmem>>, vector<8x32xf32>
      tpu.vector_store %arg19[%c0_83, %c0_84], %209 {strides = array<i32>} : memref<8x32xf32, #tpu.memory_space<vmem>>, vector<8x32xf32>,
    } else {
    }
    %c0 = arith.constant 0 : index
    %c0_1 = arith.constant 0 : index
    %3 = vector.load %arg19[%c0, %c0_1] : memref<8x32xf32, #tpu.memory_space<vmem>>, vector<8x32xf32>
    %4 = arith.truncf %3 : vector<8x32xf32> to vector<8x32xbf16>
    %c0_2 = arith.constant 0 : index
    %c0_3 = arith.constant 0 : index
    %c0_4 = arith.constant 0 : index
    %5 = vector.load %arg4[%c0_2, %c0_3, %c0_4] : memref<1x32x96xbf16, #tpu.memory_space<vmem>>, vector<1x32x96xbf16>
    %6 = vector.shape_cast %5 : vector<1x32x96xbf16> to vector<32x96xbf16>
    %cst = arith.constant dense<0.000000e+00> : vector<8x96xf32>
    %7 = tpu.matmul %4, %6, %cst {dimension_numbers = #tpu.dot_dimension_numbers<[1], [0], [0], [1], [0, 0, 1, 1], [], []>} : vector<8x32xbf16>, vector<32x96xbf16>, vector<8x96xf32> -> vector<8x96xf32>
    %c0_5 = arith.constant 0 : index
    %c0_6 = arith.constant 0 : index
    %c0_7 = arith.constant 0 : index
    %8 = vector.load %arg5[%c0_5, %c0_6, %c0_7] : memref<1x1x96xf32, #tpu.memory_space<vmem>>, vector<1x1x96xf32>
    %9 = vector.shape_cast %8 : vector<1x1x96xf32> to vector<1x96xf32>
    %10 = vector.broadcast %9 : vector<1x96xf32> to vector<8x96xf32>
    %11 = arith.addf %7, %10 : vector<8x96xf32>
    %12 = vector.extract_strided_slice %11 {offsets = [0, 0], sizes = [8, 32], strides = [1, 1]} : vector<8x96xf32> to vector<8x32xf32>
    %cst_8 = arith.constant 0.353553385 : f32
    %13 = vector.broadcast %cst_8 : f32 to vector<8x32xf32>
    %14 = arith.mulf %12, %13 : vector<8x32xf32>
    %15 = vector.extract_strided_slice %11 {offsets = [0, 32], sizes = [8, 32], strides = [1, 1]} : vector<8x96xf32> to vector<8x32xf32>
    %16 = vector.extract_strided_slice %11 {offsets = [0, 64], sizes = [8, 32], strides = [1, 1]} : vector<8x96xf32> to vector<8x32xf32>
    %17 = tpu.iota {dimensions = array<i32: 0>} : vector<8x8xi32>
    %18 = tpu.iota {dimensions = array<i32: 1>} : vector<8x8xi32>
    %19 = arith.cmpi sgt, %18, %17 : vector<8x8xi32>
    %cst_9 = arith.constant -1.000000e+30 : f32
    %cst_10 = arith.constant 0.000000e+00 : f32
    %20 = vector.broadcast %cst_9 : f32 to vector<8x8xf32>
    %21 = vector.broadcast %cst_10 : f32 to vector<8x8xf32>
    %22 = arith.select %19, %20, %21 : vector<8x8xi1>, vector<8x8xf32>
    %c0_11 = arith.constant 0 : index
    %c0_12 = arith.constant 0 : index
    %c0_13 = arith.constant 0 : index
    %23 = vector.load %arg6[%c0_11, %c0_12, %c0_13] : memref<1x32x32xbf16, #tpu.memory_space<vmem>>, vector<1x32x32xbf16>
    %24 = vector.shape_cast %23 : vector<1x32x32xbf16> to vector<32x32xbf16>
    %cst_14 = arith.constant 0.000000e+00 : f32
    %25 = vector.broadcast %cst_14 : f32 to vector<8x32xf32>
    %26 = vector.extract_strided_slice %14 {offsets = [0, 0], sizes = [8, 8], strides = [1, 1]} : vector<8x32xf32> to vector<8x8xf32>
    %27 = arith.truncf %26 : vector<8x8xf32> to vector<8x8xbf16>
    %28 = vector.extract_strided_slice %15 {offsets = [0, 0], sizes = [8, 8], strides = [1, 1]} : vector<8x32xf32> to vector<8x8xf32>
    %29 = arith.truncf %28 : vector<8x8xf32> to vector<8x8xbf16>
    %30 = vector.extract_strided_slice %16 {offsets = [0, 0], sizes = [8, 8], strides = [1, 1]} : vector<8x32xf32> to vector<8x8xf32>
    %31 = arith.truncf %30 : vector<8x8xf32> to vector<8x8xbf16>
    %32 = tpu.transpose %29, [1, 0] : vector<8x8xbf16> -> vector<8x8xbf16>
    %cst_15 = arith.constant dense<0.000000e+00> : vector<8x8xf32>
    %33 = tpu.matmul %27, %32, %cst_15 {dimension_numbers = #tpu.dot_dimension_numbers<[1], [0], [0], [1], [0, 0, 1, 1], [], []>} : vector<8x8xbf16>, vector<8x8xbf16>, vector<8x8xf32> -> vector<8x8xf32>
    %34 = arith.addf %33, %22 : vector<8x8xf32>
    %cst_16 = arith.constant dense<0xFF800000> : vector<8xf32>
    %35 = vector.multi_reduction <maximumf>, %34, %cst_16 [1] : vector<8x8xf32> to vector<8xf32>
    %36 = vector.shape_cast %35 : vector<8xf32> to vector<8x1xf32>
    %37 = vector.broadcast %36 : vector<8x1xf32> to vector<8x8xf32>
    %38 = arith.subf %34, %37 : vector<8x8xf32>
    %39 = math.exp %38 : vector<8x8xf32>
    %cst_17 = arith.constant dense<0.000000e+00> : vector<8xf32>
    %40 = vector.multi_reduction <add>, %39, %cst_17 [1] : vector<8x8xf32> to vector<8xf32>
    %41 = vector.shape_cast %40 : vector<8xf32> to vector<8x1xf32>
    %42 = tpu.reciprocal %41 {approx = true} : vector<8x1xf32> -> vector<8x1xf32>
    %43 = vector.broadcast %42 : vector<8x1xf32> to vector<8x8xf32>
    %44 = arith.mulf %39, %43 : vector<8x8xf32>
    %45 = arith.truncf %44 : vector<8x8xf32> to vector<8x8xbf16>
    %cst_18 = arith.constant dense<0.000000e+00> : vector<8x8xf32>
    %46 = tpu.matmul %45, %31, %cst_18 {dimension_numbers = #tpu.dot_dimension_numbers<[1], [0], [0], [1], [0, 0, 1, 1], [], []>} : vector<8x8xbf16>, vector<8x8xbf16>, vector<8x8xf32> -> vector<8x8xf32>
    %47 = arith.truncf %46 : vector<8x8xf32> to vector<8x8xbf16>
    %48 = vector.extract_strided_slice %24 {offsets = [0, 0], sizes = [8, 32], strides = [1, 1]} : vector<32x32xbf16> to vector<8x32xbf16>
    %cst_19 = arith.constant dense<0.000000e+00> : vector<8x32xf32>
    %49 = tpu.matmul %47, %48, %cst_19 {dimension_numbers = #tpu.dot_dimension_numbers<[1], [0], [0], [1], [0, 0, 1, 1], [], []>} : vector<8x8xbf16>, vector<8x32xbf16>, vector<8x32xf32> -> vector<8x32xf32>
    %50 = arith.addf %25, %49 : vector<8x32xf32>
    %51 = vector.extract_strided_slice %14 {offsets = [0, 8], sizes = [8, 8], strides = [1, 1]} : vector<8x32xf32> to vector<8x8xf32>
    %52 = arith.truncf %51 : vector<8x8xf32> to vector<8x8xbf16>
    %53 = vector.extract_strided_slice %15 {offsets = [0, 8], sizes = [8, 8], strides = [1, 1]} : vector<8x32xf32> to vector<8x8xf32>
    %54 = arith.truncf %53 : vector<8x8xf32> to vector<8x8xbf16>
    %55 = vector.extract_strided_slice %16 {offsets = [0, 8], sizes = [8, 8], strides = [1, 1]} : vector<8x32xf32> to vector<8x8xf32>
    %56 = arith.truncf %55 : vector<8x8xf32> to vector<8x8xbf16>
    %57 = tpu.transpose %54, [1, 0] : vector<8x8xbf16> -> vector<8x8xbf16>
    %cst_20 = arith.constant dense<0.000000e+00> : vector<8x8xf32>
    %58 = tpu.matmul %52, %57, %cst_20 {dimension_numbers = #tpu.dot_dimension_numbers<[1], [0], [0], [1], [0, 0, 1, 1], [], []>} : vector<8x8xbf16>, vector<8x8xbf16>, vector<8x8xf32> -> vector<8x8xf32>
    %59 = arith.addf %58, %22 : vector<8x8xf32>
    %cst_21 = arith.constant dense<0xFF800000> : vector<8xf32>
    %60 = vector.multi_reduction <maximumf>, %59, %cst_21 [1] : vector<8x8xf32> to vector<8xf32>
    %61 = vector.shape_cast %60 : vector<8xf32> to vector<8x1xf32>
    %62 = vector.broadcast %61 : vector<8x1xf32> to vector<8x8xf32>
    %63 = arith.subf %59, %62 : vector<8x8xf32>
    %64 = math.exp %63 : vector<8x8xf32>
    %cst_22 = arith.constant dense<0.000000e+00> : vector<8xf32>
    %65 = vector.multi_reduction <add>, %64, %cst_22 [1] : vector<8x8xf32> to vector<8xf32>
    %66 = vector.shape_cast %65 : vector<8xf32> to vector<8x1xf32>
    %67 = tpu.reciprocal %66 {approx = true} : vector<8x1xf32> -> vector<8x1xf32>
    %68 = vector.broadcast %67 : vector<8x1xf32> to vector<8x8xf32>
    %69 = arith.mulf %64, %68 : vector<8x8xf32>
    %70 = arith.truncf %69 : vector<8x8xf32> to vector<8x8xbf16>
    %cst_23 = arith.constant dense<0.000000e+00> : vector<8x8xf32>
    %71 = tpu.matmul %70, %56, %cst_23 {dimension_numbers = #tpu.dot_dimension_numbers<[1], [0], [0], [1], [0, 0, 1, 1], [], []>} : vector<8x8xbf16>, vector<8x8xbf16>, vector<8x8xf32> -> vector<8x8xf32>
    %72 = arith.truncf %71 : vector<8x8xf32> to vector<8x8xbf16>
    %73 = vector.extract_strided_slice %24 {offsets = [8, 0], sizes = [8, 32], strides = [1, 1]} : vector<32x32xbf16> to vector<8x32xbf16>
    %cst_24 = arith.constant dense<0.000000e+00> : vector<8x32xf32>
    %74 = tpu.matmul %72, %73, %cst_24 {dimension_numbers = #tpu.dot_dimension_numbers<[1], [0], [0], [1], [0, 0, 1, 1], [], []>} : vector<8x8xbf16>, vector<8x32xbf16>, vector<8x32xf32> -> vector<8x32xf32>
    %75 = arith.addf %50, %74 : vector<8x32xf32>
    %76 = vector.extract_strided_slice %14 {offsets = [0, 16], sizes = [8, 8], strides = [1, 1]} : vector<8x32xf32> to vector<8x8xf32>
    %77 = arith.truncf %76 : vector<8x8xf32> to vector<8x8xbf16>
    %78 = vector.extract_strided_slice %15 {offsets = [0, 16], sizes = [8, 8], strides = [1, 1]} : vector<8x32xf32> to vector<8x8xf32>
    %79 = arith.truncf %78 : vector<8x8xf32> to vector<8x8xbf16>
    %80 = vector.extract_strided_slice %16 {offsets = [0, 16], sizes = [8, 8], strides = [1, 1]} : vector<8x32xf32> to vector<8x8xf32>
    %81 = arith.truncf %80 : vector<8x8xf32> to vector<8x8xbf16>
    %82 = tpu.transpose %79, [1, 0] : vector<8x8xbf16> -> vector<8x8xbf16>
    %cst_25 = arith.constant dense<0.000000e+00> : vector<8x8xf32>
    %83 = tpu.matmul %77, %82, %cst_25 {dimension_numbers = #tpu.dot_dimension_numbers<[1], [0], [0], [1], [0, 0, 1, 1], [], []>} : vector<8x8xbf16>, vector<8x8xbf16>, vector<8x8xf32> -> vector<8x8xf32>
    %84 = arith.addf %83, %22 : vector<8x8xf32>
    %cst_26 = arith.constant dense<0xFF800000> : vector<8xf32>
    %85 = vector.multi_reduction <maximumf>, %84, %cst_26 [1] : vector<8x8xf32> to vector<8xf32>
    %86 = vector.shape_cast %85 : vector<8xf32> to vector<8x1xf32>
    %87 = vector.broadcast %86 : vector<8x1xf32> to vector<8x8xf32>
    %88 = arith.subf %84, %87 : vector<8x8xf32>
    %89 = math.exp %88 : vector<8x8xf32>
    %cst_27 = arith.constant dense<0.000000e+00> : vector<8xf32>
    %90 = vector.multi_reduction <add>, %89, %cst_27 [1] : vector<8x8xf32> to vector<8xf32>
    %91 = vector.shape_cast %90 : vector<8xf32> to vector<8x1xf32>
    %92 = tpu.reciprocal %91 {approx = true} : vector<8x1xf32> -> vector<8x1xf32>
    %93 = vector.broadcast %92 : vector<8x1xf32> to vector<8x8xf32>
    %94 = arith.mulf %89, %93 : vector<8x8xf32>
    %95 = arith.truncf %94 : vector<8x8xf32> to vector<8x8xbf16>
    %cst_28 = arith.constant dense<0.000000e+00> : vector<8x8xf32>
    %96 = tpu.matmul %95, %81, %cst_28 {dimension_numbers = #tpu.dot_dimension_numbers<[1], [0], [0], [1], [0, 0, 1, 1], [], []>} : vector<8x8xbf16>, vector<8x8xbf16>, vector<8x8xf32> -> vector<8x8xf32>
    %97 = arith.truncf %96 : vector<8x8xf32> to vector<8x8xbf16>
    %98 = vector.extract_strided_slice %24 {offsets = [16, 0], sizes = [8, 32], strides = [1, 1]} : vector<32x32xbf16> to vector<8x32xbf16>
    %cst_29 = arith.constant dense<0.000000e+00> : vector<8x32xf32>
    %99 = tpu.matmul %97, %98, %cst_29 {dimension_numbers = #tpu.dot_dimension_numbers<[1], [0], [0], [1], [0, 0, 1, 1], [], []>} : vector<8x8xbf16>, vector<8x32xbf16>, vector<8x32xf32> -> vector<8x32xf32>
    %100 = arith.addf %75, %99 : vector<8x32xf32>
    %101 = vector.extract_strided_slice %14 {offsets = [0, 24], sizes = [8, 8], strides = [1, 1]} : vector<8x32xf32> to vector<8x8xf32>
    %102 = arith.truncf %101 : vector<8x8xf32> to vector<8x8xbf16>
    %103 = vector.extract_strided_slice %15 {offsets = [0, 24], sizes = [8, 8], strides = [1, 1]} : vector<8x32xf32> to vector<8x8xf32>
    %104 = arith.truncf %103 : vector<8x8xf32> to vector<8x8xbf16>
    %105 = vector.extract_strided_slice %16 {offsets = [0, 24], sizes = [8, 8], strides = [1, 1]} : vector<8x32xf32> to vector<8x8xf32>
    %106 = arith.truncf %105 : vector<8x8xf32> to vector<8x8xbf16>
    %107 = tpu.transpose %104, [1, 0] : vector<8x8xbf16> -> vector<8x8xbf16>
    %cst_30 = arith.constant dense<0.000000e+00> : vector<8x8xf32>
    %108 = tpu.matmul %102, %107, %cst_30 {dimension_numbers = #tpu.dot_dimension_numbers<[1], [0], [0], [1], [0, 0, 1, 1], [], []>} : vector<8x8xbf16>, vector<8x8xbf16>, vector<8x8xf32> -> vector<8x8xf32>
    %109 = arith.addf %108, %22 : vector<8x8xf32>
    %cst_31 = arith.constant dense<0xFF800000> : vector<8xf32>
    %110 = vector.multi_reduction <maximumf>, %109, %cst_31 [1] : vector<8x8xf32> to vector<8xf32>
    %111 = vector.shape_cast %110 : vector<8xf32> to vector<8x1xf32>
    %112 = vector.broadcast %111 : vector<8x1xf32> to vector<8x8xf32>
    %113 = arith.subf %109, %112 : vector<8x8xf32>
    %114 = math.exp %113 : vector<8x8xf32>
    %cst_32 = arith.constant dense<0.000000e+00> : vector<8xf32>
    %115 = vector.multi_reduction <add>, %114, %cst_32 [1] : vector<8x8xf32> to vector<8xf32>
    %116 = vector.shape_cast %115 : vector<8xf32> to vector<8x1xf32>
    %117 = tpu.reciprocal %116 {approx = true} : vector<8x1xf32> -> vector<8x1xf32>
    %118 = vector.broadcast %117 : vector<8x1xf32> to vector<8x8xf32>
    %119 = arith.mulf %114, %118 : vector<8x8xf32>
    %120 = arith.truncf %119 : vector<8x8xf32> to vector<8x8xbf16>
    %cst_33 = arith.constant dense<0.000000e+00> : vector<8x8xf32>
    %121 = tpu.matmul %120, %106, %cst_33 {dimension_numbers = #tpu.dot_dimension_numbers<[1], [0], [0], [1], [0, 0, 1, 1], [], []>} : vector<8x8xbf16>, vector<8x8xbf16>, vector<8x8xf32> -> vector<8x8xf32>
    %122 = arith.truncf %121 : vector<8x8xf32> to vector<8x8xbf16>
    %123 = vector.extract_strided_slice %24 {offsets = [24, 0], sizes = [8, 32], strides = [1, 1]} : vector<32x32xbf16> to vector<8x32xbf16>
    %cst_34 = arith.constant dense<0.000000e+00> : vector<8x32xf32>
    %124 = tpu.matmul %122, %123, %cst_34 {dimension_numbers = #tpu.dot_dimension_numbers<[1], [0], [0], [1], [0, 0, 1, 1], [], []>} : vector<8x8xbf16>, vector<8x32xbf16>, vector<8x32xf32> -> vector<8x32xf32>
    %125 = arith.addf %100, %124 : vector<8x32xf32>
    %c0_35 = arith.constant 0 : index
    %c0_36 = arith.constant 0 : index
    %c0_37 = arith.constant 0 : index
    %126 = vector.load %arg7[%c0_35, %c0_36, %c0_37] : memref<1x1x32xf32, #tpu.memory_space<vmem>>, vector<1x1x32xf32>
    %127 = vector.shape_cast %126 : vector<1x1x32xf32> to vector<1x32xf32>
    %128 = vector.broadcast %127 : vector<1x32xf32> to vector<8x32xf32>
    %129 = arith.addf %125, %128 : vector<8x32xf32>
    %130 = arith.addf %3, %129 : vector<8x32xf32>
    %c0_38 = arith.constant 0 : index
    %c0_39 = arith.constant 0 : index
    %c0_40 = arith.constant 0 : index
    %131 = vector.load %arg8[%c0_38, %c0_39, %c0_40] : memref<1x1x32xf32, #tpu.memory_space<vmem>>, vector<1x1x32xf32>
    %132 = vector.shape_cast %131 : vector<1x1x32xf32> to vector<1x32xf32>
    %c0_41 = arith.constant 0 : index
    %c0_42 = arith.constant 0 : index
    %c0_43 = arith.constant 0 : index
    %133 = vector.load %arg9[%c0_41, %c0_42, %c0_43] : memref<1x1x32xf32, #tpu.memory_space<vmem>>, vector<1x1x32xf32>
    %134 = vector.shape_cast %133 : vector<1x1x32xf32> to vector<1x32xf32>
    %cst_44 = arith.constant dense<0.000000e+00> : vector<8xf32>
    %135 = vector.multi_reduction <add>, %130, %cst_44 [1] : vector<8x32xf32> to vector<8xf32>
    %136 = vector.shape_cast %135 : vector<8xf32> to vector<8x1xf32>
    %cst_45 = arith.constant 3.200000e+01 : f32
    %137 = vector.broadcast %cst_45 : f32 to vector<8x1xf32>
    %138 = arith.divf %136, %137 : vector<8x1xf32>
    %139 = vector.broadcast %138 : vector<8x1xf32> to vector<8x32xf32>
    %140 = arith.subf %130, %139 : vector<8x32xf32>
    %141 = arith.mulf %140, %140 : vector<8x32xf32>
    %cst_46 = arith.constant dense<0.000000e+00> : vector<8xf32>
    %142 = vector.multi_reduction <add>, %141, %cst_46 [1] : vector<8x32xf32> to vector<8xf32>
    %143 = vector.shape_cast %142 : vector<8xf32> to vector<8x1xf32>
    %cst_47 = arith.constant 3.200000e+01 : f32
    %144 = vector.broadcast %cst_47 : f32 to vector<8x1xf32>
    %145 = arith.divf %143, %144 : vector<8x1xf32>
    %146 = vector.broadcast %138 : vector<8x1xf32> to vector<8x32xf32>
    %147 = arith.subf %130, %146 : vector<8x32xf32>
    %cst_48 = arith.constant 9.99999974E-6 : f32
    %148 = vector.broadcast %cst_48 : f32 to vector<8x1xf32>
    %149 = arith.addf %145, %148 : vector<8x1xf32>
    %150 = math.rsqrt %149 : vector<8x1xf32>
    %151 = vector.broadcast %150 : vector<8x1xf32> to vector<8x32xf32>
    %152 = arith.mulf %147, %151 : vector<8x32xf32>
    %153 = vector.broadcast %132 : vector<1x32xf32> to vector<8x32xf32>
    %154 = arith.mulf %152, %153 : vector<8x32xf32>
    %155 = vector.broadcast %134 : vector<1x32xf32> to vector<8x32xf32>
    %156 = arith.addf %154, %155 : vector<8x32xf32>
    %157 = arith.truncf %156 : vector<8x32xf32> to vector<8x32xbf16>
    %c0_49 = arith.constant 0 : index
    %c0_50 = arith.constant 0 : index
    %c0_51 = arith.constant 0 : index
    %158 = vector.load %arg10[%c0_49, %c0_50, %c0_51] : memref<1x32x64xbf16, #tpu.memory_space<vmem>>, vector<1x32x64xbf16>
    %159 = vector.shape_cast %158 : vector<1x32x64xbf16> to vector<32x64xbf16>
    %cst_52 = arith.constant dense<0.000000e+00> : vector<8x64xf32>
    %160 = tpu.matmul %157, %159, %cst_52 {dimension_numbers = #tpu.dot_dimension_numbers<[1], [0], [0], [1], [0, 0, 1, 1], [], []>} : vector<8x32xbf16>, vector<32x64xbf16>, vector<8x64xf32> -> vector<8x64xf32>
    %c0_53 = arith.constant 0 : index
    %c0_54 = arith.constant 0 : index
    %c0_55 = arith.constant 0 : index
    %161 = vector.load %arg11[%c0_53, %c0_54, %c0_55] : memref<1x1x64xf32, #tpu.memory_space<vmem>>, vector<1x1x64xf32>
    %162 = vector.shape_cast %161 : vector<1x1x64xf32> to vector<1x64xf32>
    %163 = vector.broadcast %162 : vector<1x64xf32> to vector<8x64xf32>
    %164 = arith.addf %160, %163 : vector<8x64xf32>
    %cst_56 = arith.constant 0.000000e+00 : f32
    %165 = vector.broadcast %cst_56 : f32 to vector<8x64xf32>
    %166 = arith.maximumf %164, %165 : vector<8x64xf32>
    %167 = arith.truncf %166 : vector<8x64xf32> to vector<8x64xbf16>
    %c0_57 = arith.constant 0 : index
    %c0_58 = arith.constant 0 : index
    %c0_59 = arith.constant 0 : index
    %168 = vector.load %arg12[%c0_57, %c0_58, %c0_59] : memref<1x64x32xbf16, #tpu.memory_space<vmem>>, vector<1x64x32xbf16>
    %169 = vector.shape_cast %168 : vector<1x64x32xbf16> to vector<64x32xbf16>
    %cst_60 = arith.constant dense<0.000000e+00> : vector<8x32xf32>
    %170 = tpu.matmul %167, %169, %cst_60 {dimension_numbers = #tpu.dot_dimension_numbers<[1], [0], [0], [1], [0, 0, 1, 1], [], []>} : vector<8x64xbf16>, vector<64x32xbf16>, vector<8x32xf32> -> vector<8x32xf32>
    %c0_61 = arith.constant 0 : index
    %c0_62 = arith.constant 0 : index
    %c0_63 = arith.constant 0 : index
    %171 = vector.load %arg13[%c0_61, %c0_62, %c0_63] : memref<1x1x32xf32, #tpu.memory_space<vmem>>, vector<1x1x32xf32>
    %172 = vector.shape_cast %171 : vector<1x1x32xf32> to vector<1x32xf32>
    %173 = vector.broadcast %172 : vector<1x32xf32> to vector<8x32xf32>
    %174 = arith.addf %170, %173 : vector<8x32xf32>
    %175 = arith.addf %156, %174 : vector<8x32xf32>
    %c0_64 = arith.constant 0 : index
    %c0_65 = arith.constant 0 : index
    %c0_66 = arith.constant 0 : index
    %176 = vector.load %arg14[%c0_64, %c0_65, %c0_66] : memref<1x1x32xf32, #tpu.memory_space<vmem>>, vector<1x1x32xf32>
    %177 = vector.shape_cast %176 : vector<1x1x32xf32> to vector<1x32xf32>
    %c0_67 = arith.constant 0 : index
    %c0_68 = arith.constant 0 : index
    %c0_69 = arith.constant 0 : index
    %178 = vector.load %arg15[%c0_67, %c0_68, %c0_69] : memref<1x1x32xf32, #tpu.memory_space<vmem>>, vector<1x1x32xf32>
    %179 = vector.shape_cast %178 : vector<1x1x32xf32> to vector<1x32xf32>
    %cst_70 = arith.constant dense<0.000000e+00> : vector<8xf32>
    %180 = vector.multi_reduction <add>, %175, %cst_70 [1] : vector<8x32xf32> to vector<8xf32>
    %181 = vector.shape_cast %180 : vector<8xf32> to vector<8x1xf32>
    %cst_71 = arith.constant 3.200000e+01 : f32
    %182 = vector.broadcast %cst_71 : f32 to vector<8x1xf32>
    %183 = arith.divf %181, %182 : vector<8x1xf32>
    %184 = vector.broadcast %183 : vector<8x1xf32> to vector<8x32xf32>
    %185 = arith.subf %175, %184 : vector<8x32xf32>
    %186 = arith.mulf %185, %185 : vector<8x32xf32>
    %cst_72 = arith.constant dense<0.000000e+00> : vector<8xf32>
    %187 = vector.multi_reduction <add>, %186, %cst_72 [1] : vector<8x32xf32> to vector<8xf32>
    %188 = vector.shape_cast %187 : vector<8xf32> to vector<8x1xf32>
    %cst_73 = arith.constant 3.200000e+01 : f32
    %189 = vector.broadcast %cst_73 : f32 to vector<8x1xf32>
    %190 = arith.divf %188, %189 : vector<8x1xf32>
    %191 = vector.broadcast %183 : vector<8x1xf32> to vector<8x32xf32>
    %192 = arith.subf %175, %191 : vector<8x32xf32>
    %cst_74 = arith.constant 9.99999974E-6 : f32
    %193 = vector.broadcast %cst_74 : f32 to vector<8x1xf32>
    %194 = arith.addf %190, %193 : vector<8x1xf32>
    %195 = math.rsqrt %194 : vector<8x1xf32>
    %196 = vector.broadcast %195 : vector<8x1xf32> to vector<8x32xf32>
    %197 = arith.mulf %192, %196 : vector<8x32xf32>
    %198 = vector.broadcast %177 : vector<1x32xf32> to vector<8x32xf32>
    %199 = arith.mulf %197, %198 : vector<8x32xf32>
    %200 = vector.broadcast %179 : vector<1x32xf32> to vector<8x32xf32>
    %201 = arith.addf %199, %200 : vector<8x32xf32>
    %c0_75 = arith.constant 0 : index
    %c0_76 = arith.constant 0 : index
    %202 = vector.load %arg19[%c0_75, %c0_76] : memref<8x32xf32, #tpu.memory_space<vmem>>, vector<8x32xf32>
    tpu.vector_store %arg19[%c0_75, %c0_76], %201 {strides = array<i32>} : memref<8x32xf32, #tpu.memory_space<vmem>>, vector<8x32xf32>,
    %c1_i32 = arith.constant 1 : i32
    %203 = arith.cmpi eq, %arg1, %c1_i32 : i32
    %204 = arith.extui %203 : i1 to i32
    %c0_i32_77 = arith.constant 0 : i32
    %205 = arith.cmpi ne, %204, %c0_i32_77 : i32
    scf.if %205 {
      %c0_78 = arith.constant 0 : index
      %c0_79 = arith.constant 0 : index
      %206 = vector.load %arg16[%c0_78, %c0_79] : memref<1x32xf32, #tpu.memory_space<vmem>>, vector<1x32xf32>
      %c0_80 = arith.constant 0 : index
      %c0_81 = arith.constant 0 : index
      %207 = vector.load %arg17[%c0_80, %c0_81] : memref<1x32xf32, #tpu.memory_space<vmem>>, vector<1x32xf32>
      %cst_82 = arith.constant dense<0.000000e+00> : vector<8xf32>
      %208 = vector.multi_reduction <add>, %201, %cst_82 [1] : vector<8x32xf32> to vector<8xf32>
      %209 = vector.shape_cast %208 : vector<8xf32> to vector<8x1xf32>
      %cst_83 = arith.constant 3.200000e+01 : f32
      %210 = vector.broadcast %cst_83 : f32 to vector<8x1xf32>
      %211 = arith.divf %209, %210 : vector<8x1xf32>
      %212 = vector.broadcast %211 : vector<8x1xf32> to vector<8x32xf32>
      %213 = arith.subf %201, %212 : vector<8x32xf32>
      %214 = arith.mulf %213, %213 : vector<8x32xf32>
      %cst_84 = arith.constant dense<0.000000e+00> : vector<8xf32>
      %215 = vector.multi_reduction <add>, %214, %cst_84 [1] : vector<8x32xf32> to vector<8xf32>
      %216 = vector.shape_cast %215 : vector<8xf32> to vector<8x1xf32>
      %cst_85 = arith.constant 3.200000e+01 : f32
      %217 = vector.broadcast %cst_85 : f32 to vector<8x1xf32>
      %218 = arith.divf %216, %217 : vector<8x1xf32>
      %219 = vector.broadcast %211 : vector<8x1xf32> to vector<8x32xf32>
      %220 = arith.subf %201, %219 : vector<8x32xf32>
      %cst_86 = arith.constant 9.99999974E-6 : f32
      %221 = vector.broadcast %cst_86 : f32 to vector<8x1xf32>
      %222 = arith.addf %218, %221 : vector<8x1xf32>
      %223 = math.rsqrt %222 : vector<8x1xf32>
      %224 = vector.broadcast %223 : vector<8x1xf32> to vector<8x32xf32>
      %225 = arith.mulf %220, %224 : vector<8x32xf32>
      %226 = vector.broadcast %206 : vector<1x32xf32> to vector<8x32xf32>
      %227 = arith.mulf %225, %226 : vector<8x32xf32>
      %228 = vector.broadcast %207 : vector<1x32xf32> to vector<8x32xf32>
      %229 = arith.addf %227, %228 : vector<8x32xf32>
      %c0_87 = arith.constant 0 : index
      %c0_88 = arith.constant 0 : index
      %c0_89 = arith.constant 0 : index
      %230 = vector.load %arg18[%c0_87, %c0_88, %c0_89] : memref<1x8x32xf32, #tpu.memory_space<vmem>>, vector<1x8x32xf32>
      %231 = vector.shape_cast %230 : vector<1x8x32xf32> to vector<8x32xf32>
      %232 = vector.shape_cast %229 : vector<8x32xf32> to vector<1x8x32xf32>
      tpu.vector_store %arg18[%c0_87, %c0_88, %c0_89], %232 {strides = array<i32>} : memref<1x8x32xf32, #tpu.memory_space<vmem>>, vector<1x8x32xf32>,
    } else {
    }
    return
  }
  func.func @transform_0(%arg0: i32, %arg1: i32) -> (i32, i32, i32) {
    %c0_i32 = arith.constant 0 : i32
    %c0_i32_0 = arith.constant 0 : i32
    %c0_i32_1 = arith.constant 0 : i32
    return %arg0, %c0_i32, %c0_i32_0 : i32, i32, i32
  }
  func.func @transform_1(%arg0: i32, %arg1: i32) -> (i32, i32) {
    %c0_i32 = arith.constant 0 : i32
    %c0_i32_0 = arith.constant 0 : i32
    %c0_i32_1 = arith.constant 0 : i32
    return %c0_i32, %c0_i32_0 : i32, i32
  }
  func.func @transform_2(%arg0: i32, %arg1: i32) -> (i32, i32, i32) {
    %c0_i32 = arith.constant 0 : i32
    %c0_i32_0 = arith.constant 0 : i32
    %c0_i32_1 = arith.constant 0 : i32
    return %arg1, %c0_i32, %c0_i32_0 : i32, i32, i32
  }
  func.func @transform_3(%arg0: i32, %arg1: i32) -> (i32, i32, i32) {
    %c0_i32 = arith.constant 0 : i32
    %c0_i32_0 = arith.constant 0 : i32
    %c0_i32_1 = arith.constant 0 : i32
    return %arg1, %c0_i32, %c0_i32_0 : i32, i32, i32
  }
  func.func @transform_4(%arg0: i32, %arg1: i32) -> (i32, i32, i32) {
    %c0_i32 = arith.constant 0 : i32
    %c0_i32_0 = arith.constant 0 : i32
    %c0_i32_1 = arith.constant 0 : i32
    return %arg1, %c0_i32, %c0_i32_0 : i32, i32, i32
  }
  func.func @transform_5(%arg0: i32, %arg1: i32) -> (i32, i32, i32) {
    %c0_i32 = arith.constant 0 : i32
    %c0_i32_0 = arith.constant 0 : i32
    %c0_i32_1 = arith.constant 0 : i32
    return %arg1, %c0_i32, %c0_i32_0 : i32, i32, i32
  }
  func.func @transform_6(%arg0: i32, %arg1: i32) -> (i32, i32, i32) {
    %c0_i32 = arith.constant 0 : i32
    %c0_i32_0 = arith.constant 0 : i32
    %c0_i32_1 = arith.constant 0 : i32
    return %arg1, %c0_i32, %c0_i32_0 : i32, i32, i32
  }
  func.func @transform_7(%arg0: i32, %arg1: i32) -> (i32, i32, i32) {
    %c0_i32 = arith.constant 0 : i32
    %c0_i32_0 = arith.constant 0 : i32
    %c0_i32_1 = arith.constant 0 : i32
    return %arg1, %c0_i32, %c0_i32_0 : i32, i32, i32
  }
  func.func @transform_8(%arg0: i32, %arg1: i32) -> (i32, i32, i32) {
    %c0_i32 = arith.constant 0 : i32
    %c0_i32_0 = arith.constant 0 : i32
    %c0_i32_1 = arith.constant 0 : i32
    return %arg1, %c0_i32, %c0_i32_0 : i32, i32, i32
  }
  func.func @transform_9(%arg0: i32, %arg1: i32) -> (i32, i32, i32) {
    %c0_i32 = arith.constant 0 : i32
    %c0_i32_0 = arith.constant 0 : i32
    %c0_i32_1 = arith.constant 0 : i32
    return %arg1, %c0_i32, %c0_i32_0 : i32, i32, i32
  }
  func.func @transform_10(%arg0: i32, %arg1: i32) -> (i32, i32, i32) {
    %c0_i32 = arith.constant 0 : i32
    %c0_i32_0 = arith.constant 0 : i32
    %c0_i32_1 = arith.constant 0 : i32
    return %arg1, %c0_i32, %c0_i32_0 : i32, i32, i32
  }
  func.func @transform_11(%arg0: i32, %arg1: i32) -> (i32, i32, i32) {
    %c0_i32 = arith.constant 0 : i32
    %c0_i32_0 = arith.constant 0 : i32
    %c0_i32_1 = arith.constant 0 : i32
    return %arg1, %c0_i32, %c0_i32_0 : i32, i32, i32
  }
  func.func @transform_12(%arg0: i32, %arg1: i32) -> (i32, i32, i32) {
    %c0_i32 = arith.constant 0 : i32
    %c0_i32_0 = arith.constant 0 : i32
    %c0_i32_1 = arith.constant 0 : i32
    return %arg1, %c0_i32, %c0_i32_0 : i32, i32, i32
  }
  func.func @transform_13(%arg0: i32, %arg1: i32) -> (i32, i32, i32) {
    %c0_i32 = arith.constant 0 : i32
    %c0_i32_0 = arith.constant 0 : i32
    %c0_i32_1 = arith.constant 0 : i32
    return %arg1, %c0_i32, %c0_i32_0 : i32, i32, i32
  }
  func.func @transform_14(%arg0: i32, %arg1: i32) -> (i32, i32) {
    %c0_i32 = arith.constant 0 : i32
    %c0_i32_0 = arith.constant 0 : i32
    %c0_i32_1 = arith.constant 0 : i32
    return %c0_i32, %c0_i32_0 : i32, i32
  }
  func.func @transform_15(%arg0: i32, %arg1: i32) -> (i32, i32) {
    %c0_i32 = arith.constant 0 : i32
    %c0_i32_0 = arith.constant 0 : i32
    %c0_i32_1 = arith.constant 0 : i32
    return %c0_i32, %c0_i32_0 : i32, i32
  }
  func.func @transform_16(%arg0: i32, %arg1: i32) -> (i32, i32, i32) {
    %c0_i32 = arith.constant 0 : i32
    %c0_i32_0 = arith.constant 0 : i32
    %c0_i32_1 = arith.constant 0 : i32
    return %arg0, %c0_i32, %c0_i32_0 : i32, i32, i32
  }
}

</mosaic_0001>

<bundles_post_ra>
// kernel: tpu_custom_call.1
= control target key start
LH: loop header
LB: loop body
LE: loop exit
PB: predicated region body
PF: predicated region fallthrough
CT: control target
= control target key end

     0   :  { %s2959_s0 = inlined_call_operand.hbm [shape: f32[2,8,32], index: 0, kind: input, shape index: {}]   ;;  %s2960_s1 = inlined_call_operand.hbm [shape: f32[8,32], index: 1, kind: input, shape index: {}]   ;;  %s2961_s2 = inlined_call_operand.vmem [shape: bf16[2,32,96], index: 2, kind: input, shape index: {}]   ;;  %s2962_s3 = inlined_call_operand.vmem [shape: f32[2,1,96], index: 3, kind: input, shape index: {}]   ;;  %s2963_s4 = inlined_call_operand.vmem [shape: bf16[2,32,32], index: 4, kind: input, shape index: {}]   ;;  %s2964_s5 = inlined_call_operand.vmem [shape: f32[2,1,32], index: 5, kind: input, shape index: {}]   ;;  %s2965_s6 = inlined_call_operand.vmem [shape: f32[2,1,32], index: 6, kind: input, shape index: {}]   ;;  %s2966_s7 = inlined_call_operand.vmem [shape: f32[2,1,32], index: 7, kind: input, shape index: {}]   ;;  %s2967_s8 = inlined_call_operand.vmem [shape: bf16[2,32,64], index: 8, kind: input, shape index: {}]   ;;  %s2968_s9 = inlined_call_operand.vmem [shape: f32[2,1,64], index: 9, kind: input, shape index: {}]   ;;  %s2969_s10 = inlined_call_operand.vmem [shape: bf16[2,64,32], index: 10, kind: input, shape index: {}]   ;;  %s2970_s11 = inlined_call_operand.vmem [shape: f32[2,1,32], index: 11, kind: input, shape index: {}]   ;;  %s2971_s12 = inlined_call_operand.vmem [shape: f32[2,1,32], index: 12, kind: input, shape index: {}]   ;;  %s2972_s13 = inlined_call_operand.vmem [shape: f32[2,1,32], index: 13, kind: input, shape index: {}]   ;;  %s2973_s14 = inlined_call_operand.vmem [shape: f32[1,32], index: 14, kind: input, shape index: {}]   ;;  %s2974_s15 = inlined_call_operand.vmem [shape: f32[1,32], index: 15, kind: input, shape index: {}]   ;;  %s2975_s16 = inlined_call_operand.hbm [shape: f32[2,8,32], index: 16, kind: output, shape index: {}]  }
   0x1   :  { %2990 = sst [smem:[#allocation25_spill]] %s2959_s0 }
   0x2   :  { %2991 = sst [smem:[#allocation26_spill]] %s2960_s1 }
   0x3   :  { %2992 = sst [smem:[#allocation27_spill]] %s2961_s2 }
   0x4   :  { %2993 = sst [smem:[#allocation28_spill]] %s2963_s4 }
   0x5   :  { %2994 = sst [smem:[#allocation29_spill]] %s2966_s7 }
   0x6   :  { %2995 = sst [smem:[#allocation30_spill]] %s2967_s8 }
   0x7   :  { %2996 = sst [smem:[#allocation31_spill]] %s2969_s10 }
   0x8   :  { %2997 = sst [smem:[#allocation32_spill]] %s2970_s11 }
   0x9   :  { %2998 = sst [smem:[#allocation33_spill]] %s2971_s12 }
   0xa   :  { %2999 = sst [smem:[#allocation34_spill]] %s2972_s13 }
   0xb   :  { %3000 = sst [smem:[#allocation35_spill]] %s2973_s14 }
   0xc   :  { %3001 = sst [smem:[#allocation36_spill]] %s2974_s15 }
   0xd   :  { %3002 = sst [smem:[#allocation37_spill]] %s2975_s16 }
   0xe   :  { %21 = vsyncpa [#allocation4], 0 }
   0xf   :  { %23 = vsyncpa [#allocation4 + $0x1], 0 }
  0x10   :  { %24 = vsyncpa [#allocation7], 0 }
  0x11   :  { %25 = vsyncpa [#allocation5], 0 }
  0x12   :  { %27 = vsyncpa [#allocation5 + $0x1], 0  ;;  %s2545_s21 = smov 0   ;;  %s2547_s22 = smov 0  }
  0x13   :  { %s2549_s23 = smov 0   ;;  %s2551_s24 = smov 0  }
  0x14   :  { %s2553_s25 = smov 0   ;;  %s2555_s26 = smov 0  }
  0x15   :  { %s2557_s27 = smov 0   ;;  %s2559_s28 = smov 0  }
  0x16 LB: > { %3003 = sst [smem:[#allocation12_spill]] %s2414_s21  ;;  %s1959_s29 = sadd.s32 4294967295, %s2442_s28   ;;  %s2442_s28 = sphi %s2559_s28, %s33_s28   ;;  %s2438_s27 = sphi %s2557_s27, %s3059_s27   ;;  %s2434_s26 = sphi %s2555_s26, %s3058_s26   ;;  %s2430_s25 = sphi %s2553_s25, %s3057_s25   ;;  %s2426_s24 = sphi %s2551_s24, %s3056_s24   ;;  %s2422_s23 = sphi %s2549_s23, %s3055_s23   ;;  %s2418_s22 = sphi %s2547_s22, %s3054_s22   ;;  %s2414_s21 = sphi %s2545_s21, %s3053_s21  }
  0x17   : > { %3004 = sst [smem:[#allocation13_spill]] %s2418_s22  ;;  %s1960_s30 = sadd.s32 4294967294, %s2442_s28  }
  0x18   : > { %3005 = sst [smem:[#allocation14_spill]] %s2422_s23  ;;  %p65_p0 = scmp.ne.s32.totalorder %s2418_s22, %s2414_s21 }
  0x19   : > { %3006 = sst [smem:[#allocation15_spill]] %s2430_s25  ;;  %p2589_p1 = scmp.eq.s32.totalorder %s1959_s29, 0 }
  0x1a   : > { %3007 = sst [smem:[#allocation16_spill]] %s2434_s26  ;;  %p2593_p2 = scmp.eq.s32.totalorder %s1959_s29, 3 }
  0x1b   : > { %3008 = sst [smem:[#allocation17_spill]] %s2438_s27  ;;  %p470_p3 = scmp.eq.s32.totalorder %s1960_s30, 3 }
  0x1c   : > { %3009 = sst [smem:[#allocation18_spill]] %s2442_s28  ;;  %p2599_p4 = por %p2589_p1, %p65_p0 }
  0x1d   : > { %p1961_p5 = scmp.ge.s32.totalorder %s2442_s28, 1  ;;  %p2604_p6 = por %p470_p3, %p65_p0 }
  0x1e   : > { %p477_p7 = scmp.lt.s32.totalorder %s2442_s28, 5  ;;  %s2444_s29 = smov [#allocation6]  }
  0x1f   : > { %s3013_s19 = scalar_select %p2604_p6, 1, 0 }
  0x20   : > { %p2609_p8 = pnand %p1961_p5, %p477_p7  ;;  %s490_s21 = sshll.u32 %s2444_s29, 4  ;;  %s491_s21 = int_to_ptr.vmem [resolvable:$true] %s490_s21 }
  0x21   : > { %3014 = sst [smem:[#allocation19_spill]] %s3013_s19  ;;  %s42_s30 = sadd.s32 1, %s2434_s26 }
  0x22   : > { %p2164_p9 = pneg %p2609_p8  ;;  %s2299_s16 = scalar_lea.vmem %s491_s21, 128 }
  0x23   : > { %p2300_p12 = scmp.ne.s32.totalorder %s491_s21, %s2299_s16  ;;  %p2307_p3 = scmp.lt.s32.totalorder %s491_s21, %s491_s21 }
  0x24   : > { %p2165_p10 = pnand %p2164_p9, %p2589_p1  ;;  %p2308_p6 = scmp.lt.s32.totalorder %s2299_s16, %s2299_s16 }
  0x26   : > { %p2290_p11 = pneg %p2165_p10  ;;  %p2309_p5 = por %p2308_p6, %p2307_p3 }
  0x28   : > { %p2302_p13 = pnand %p2300_p12, %p2290_p11 }
  0x2a   : > { %p2303_p0 = pneg %p2302_p13 }
  0x2c   : > { %p2310_p7 = pnand %p2309_p5, %p2303_p0 }
  0x2e   : > { %2313 = shalt.err (!%p2310_p7)
}
  0x2f   : > { %s3016_s1 = sld [smem:[#allocation26_spill]]  ;;  %p43_p9 = scmp.ge.s32.totalorder %s42_s30, 2 }
  0x30   : > { %s45_s16 = sadd.s32 1, %s2438_s27  ;;  %s52_s29 = sadd.s32 1, %s2422_s23 }
  0x31   : > { %p59_p6 = scmp.ne.s32.totalorder %s2422_s23, %s2418_s22  ;;  %s3061_s30 = smov (%p43_p9, %s42_s30), 0 }
  0x32   : > { %3017 = sst [smem:[#allocation20_spill]] %s3061_s30  ;;  %s3063_s16 = smov (!%p43_p9, %s45_s16), %s2438_s27 }
  0x33   : > { %p60_p11 = scmp.eq.s32.totalorder %s2442_s28, 0  ;;  %p2631_p12 = por %p2593_p2, %p59_p6 }
  0x34   : > { %p47_p13 = scmp.ge.s32.totalorder %s3063_s16, 2  ;;  %p2177_p0 = scmp.lt.s32.totalorder %s2442_s28, 4 }
  0x35   : > { %2167 = dma.hbm_to_vmem [thread:$0]  (!%p2165_p10), %s3016_s1, 128, %s491_s21, [#allocation7]  }
  0x36   : > { %s3018_s25 = scalar_select %p2631_p12, 1, 0 }
  0x37   : > { %p61_p3 = por %p60_p11, %p59_p6  ;;  %s507_s21 = sand.u32 1, %s2422_s23  }
  0x38   : > { %3019 = sst [smem:[#allocation21_spill]] %s3018_s25  ;;  %s3065_s16 = smov (%p47_p13, %s3063_s16), 0 }
  0x39   : > { %3020 = sst [smem:[#allocation22_spill]] %s3065_s16  ;;  %s1964_s19 = sshll.u32 %s507_s21, 3 }
  0x3a   : > { %s49_s1 = ssub.s32 %s2438_s27, %s3065_s16  ;;  %s1965_s30 = sshll.u32 %s2438_s27, 7 }
  0x3b   : > { %p50_p10 = scmp.eq.s32.totalorder %s49_s1, 0  ;;  %s3021_s14 = sld [smem:[#allocation25_spill]] }
  0x3c   : > { %s511_s13 = scalar_lea.vmem [#allocation3], %s1964_s19  ;;  %p2650_p2 = pnand %p2177_p0, %p61_p3 }
  0x3d   : > { %s518_s12 = sshll.u32 %s511_s13, 4  ;;  %s508_s10 = scalar_lea.sflag [#allocation4], %s507_s21  ;;  %s519_s12 = int_to_ptr.vmem [resolvable:$true] %s518_s12 }
  0x3e   : > { %s2646_s11 = scalar_select %p50_p10, %s2422_s23, %s52_s29  }
  0x3f   : > { %p2316_p5 = pneg %p2650_p2  ;;  %s2327_s1 = scalar_lea.vmem %s519_s12, 128 }
  0x40   : > { %3022 = sst [smem:[#allocation23_spill]] %s2646_s11  ;;  %p2328_p7 = scmp.ne.s32.totalorder %s519_s12, %s2327_s1 }
  0x41   : > { %s516_s17 = scalar_lea.hbm %s3021_s14, %s1965_s30  ;;  %s2445_s15 = smov [#allocation3]  }
  0x42   : > { %p2330_p9 = pnand %p2328_p7, %p2316_p5  ;;  %s2332_s14 = sshll.u32 %s2445_s15, 4  ;;  %s2333_s14 = int_to_ptr.vmem [resolvable:$false] %s2332_s14 }
  0x43   : > { %s2334_s13 = scalar_lea.vmem %s2333_s14, 256  ;;  %p2335_p11 = scmp.lt.s32.totalorder %s519_s12, %s2333_s14 }
  0x44   : > { %p2331_p6 = pneg %p2330_p9  ;;  %p2336_p13 = scmp.lt.s32.totalorder %s2334_s13, %s2327_s1 }
  0x46   : > { %p2337_p10 = por %p2336_p13, %p2335_p11 }
  0x48   : > { %p2338_p12 = pnand %p2337_p10, %p2331_p6 }
  0x4a   : > { %2341 = shalt.err (!%p2338_p12)
}
  0x4b   : > { %2171 = dma.hbm_to_vmem [thread:$0]  (!%p2650_p2), %s516_s17, 128, %s519_s12, %s508_s10  }
  0x4c   : > { %607 = sbr.rel (%p2609_p8) target bundleno = 3928 (0xf58), region = 84 }
  0x51   : > { %s2661_s26 = sand.u32 1, %s2418_s22  }
  0x52   : > { %3024 = sst [smem:[#allocation24_spill]] %s2661_s26  ;;  %s1967_s30 = sshll.u32 %s2661_s26, 3 }
  0x53   : > { %s610_s29 = scalar_lea.sflag [#allocation4], %s2661_s26  ;;  %s613_s21 = scalar_lea.vmem [#allocation3], %s1967_s30 }
  0x54   : > { %2401 = dma.done.wait (%p2599_p4), %s610_s29, 128  }
  0x55   : > { %2403 = vsyncadd (%p2599_p4), %s610_s29, 4294967168 }
  0x56   : > { %2405 = dma.done.wait (%p2589_p1), [#allocation7], 128  }
  0x57   : > { %2407 = vsyncadd (%p2589_p1), [#allocation7], 4294967168  ;;  %p710_p8 = scmp.lt.s32.totalorder %s2426_s24, 1  ;;  %s3025_s2 = sld [smem:[#allocation27_spill]] }
  0x58   : > { %s3026_s4 = sld [smem:[#allocation28_spill]]  ;;  %s2729_s1 = scalar_lea.vmem [#allocation8], %s1967_s30 }
  0x59   : > { %s2675_s10 = scalar_select %p710_p8, %s2426_s24, 1 }
  0x5a   : > { %s3028_s8 = sld [smem:[#allocation30_spill]]  ;;  %p1978_p1 = scmp.ne.s32.totalorder %s2426_s24, 0 }
  0x5b   : > { %s2017_s12 = sshll.u32 %s2675_s10, 4  ;;  %s3029_s16 = sld [smem:[#allocation31_spill]] }
  0x5c   : > { %s3030_s23 = sld [smem:[#allocation32_spill]] }
  0x5d   : > { %s714_s17 = scalar_lea.vmem %s3025_s2, %s2017_s12  ;;  %s739_s2 = scalar_lea.vmem %s2968_s9, %s2675_s10 }
  0x5e   : > { %s2688_s14 = scalar_lea.vmem %s3026_s4, %s2017_s12  ;;  %s2020_s4 = sshll.u32 %s2675_s10, 5 }
  0x5f   : > { %s3031_s26 = sld [smem:[#allocation33_spill]] }
  0x60   : > { %s2705_s19 = scalar_lea.vmem %s3028_s8, %s2017_s12  ;;  %s3032_s8 = sld [smem:[#allocation34_spill]] }
  0x61   : > { %s2715_s28 = scalar_lea.vmem %s3029_s16, %s2020_s4 }
  0x62   : > { %s747_s22 = scalar_lea.vmem %s3030_s23, %s2675_s10  ;;  %758 = sbr.rel (%p1978_p1) target bundleno = 107 (0x6b), region = 96 }
  0x65   : > { %s750_s0 = scalar_lea.vmem %s3031_s26, %s2675_s10 }
  0x66   : > { %s753_s7 = scalar_lea.vmem %s3032_s8, %s2675_s10 }
  0x67   : > { %v759_v0 = vld [vmem:[%s613_s21] sm:$0xff]  ;;  %v760_v1 = vld [vmem:[#allocation6] sm:$0xff]  ;;  %vm762_vm0 = vcmask 261120  }
  0x68   : > { %v761_v2 = vadd.f32 %v760_v1, %v759_v0 }
  0x6a   : > { %763 = vst.msk [vmem:[#allocation2] sm:$0xff] %vm762_vm0, %v761_v2 }
  0x6b PF: > { %v2258_v3 = vld [vmem:[%s714_s17 + $0x8] sm:$0xff]   ;;  %v2446_v4 = vmov 0.0   ;;  %v2259_v5 = vld [vmem:[%s714_s17] sm:$0xff]   ;;  %vm2447_vm1 = vmmov 0   ;;  %vm789_vm2 = vcmask 261120   ;;  %s3033_s23 = scalar_lea.vmem %s2962_s3, %s2675_s10  ;;  %s2448_s16 = smov 96   ;;  %v834_v22 = vlaneseq }
  0x6c   : > { %2056 = vmatprep.subr.bf16.mxu1 %v2446_v4  ;;  %2070 = vmatprep.subr.bf16.mxu0 %v2446_v4  ;;  %v1979_v8 = vld [vmem:[%s3033_s23] ss:$0 sm:$0xff]  ;;  %s2449_s26 = smov 120   ;;  %s2450_s30 = smov 88   ;;  %vm849_vm3 = vcmask 64512   ;;  %vm913_vm5 = vcmask 1043456  }
  0x6d   : > { %2057 = vmatpush3.bf16.msra.mxu1 %v2258_v3  ;;  %2060 = vmatprep.mubr.msk.bf16.mxu1 %vm2447_vm1, %v2446_v4  ;;  %v835_v23 = vshrl.u32 %v834_v22, 7  ;;  %v837_v24 = vand.u32 127, %v834_v22  ;;  %s2451_s21 = smov 64   ;;  %s2452_s17 = smov 56   ;;  %v840_v60 = vld [vmem:[%s2688_s14] sm:$0xf] }
  0x6e   : > { %2058 = vmatprep.subr.bf16.mxu1 %v2446_v4  ;;  %2072 = vmatprep.mubr.msk.bf16.mxu0 %vm2447_vm1, %v2446_v4  ;;  %s2453_s20 = smov 112   ;;  %s2454_s15 = smov 80   ;;  %v1120_v61 = vsel %vm913_vm5, %v840_v60, 0  ;;  %v841_v62 = vld [vmem:[%s2688_s14 + $0x4] sm:$0xf]  ;;  %vm1625_vm6 = vcmask 523264  }
  0x6f   : > { %vm838_vm4 = vcmp.gt.s32.totalorder %v837_v24, %v835_v23  ;;  %v1074_v63 = vsel %vm913_vm5, %v841_v62, 0  ;;  %s2455_s13 = smov 72   ;;  %s2456_s29 = smov 104  }
  0x70   : > { %v2771_v25 = vsel %vm838_vm4, -1e+30, %v2446_v4  ;;  %s2457_s11 = smov 48   ;;  %s2458_s27 = smov 40  }
  0x71   : > { %v2736_v6 = vld [vmem:[#allocation2] sm:$0xff]  ;;  %2059 = vmatpush3.bf16.msra.mxu1 %v2259_v5  ;;  %s3034_s12 = scalar_lea.vmem %s2964_s5, %s2675_s10  ;;  %s3035_s4 = scalar_lea.vmem %s2965_s6, %s2675_s10 }
  0x72   : > { %v765_v7 = vpack.c.bf16 %v2736_v6, %v2736_v6  ;;  %2064 = vmatprep.subr.bf16.mxu1 %v2446_v4  ;;  %p2010_p4 = scmp.ne.s32.totalorder %s2426_s24, 1 }
  0x73   : > { %s3041_s24 = sld [smem:[#allocation35_spill]] (!%p2010_p4) }
  0x74   : > { %2061 = vmatmul.mubr.msk.bf16.vlgmr.msra.gmra.mxu1 %vm789_vm2, %v765_v7 }
  0x75   : > { %2066 = vmatprep.mubr.msk.bf16.mxu1 %vm2447_vm1, %v2446_v4 }
 0x134   : > { %v827_v9 = vpop.f32.mrf.mxu1 }
 0x135   : > { %v828_v10 = vadd.f32 %v1979_v8, %v827_v9 }
 0x136   : > { %v2062_v11 = vpop.f32.mrf.mxu1 }
 0x137   : > { %v833_v12 = vmul.f32 0.35355338, %v828_v10  ;;  %v2752_v13 = vpack.c.bf16 %v828_v10, %v828_v10 }
 0x138   : > { %v830_v14 = vpop.f32.mrf.mxu1 }
 0x139   : > { %v2754_v15 = vpack.c.bf16 %v833_v12, %v833_v12  ;;  %847 = vrot.lane.b32.xlu0 %v2752_v13, %s2448_s16  ;;  %s3036_s16 = sld [smem:[#allocation29_spill]] }
 0x13a   : > { %v2063_v16 = vpop.f32.mrf.mxu1 }
 0x13b   : > { %959 = vrot.lane.b32.xlu1 %v2754_v15, %s2449_s26 }
 0x13d   : > { %961 = vrot.lane.b32.xlu0 %v2752_v13, %s2450_s30 }
 0x13f   : > { %s3037_s26 = scalar_lea.vmem %s3036_s16, %s2675_s10 }
 0x1ab   : > { %v848_v17 = vpop.permute.xlu0 %847 }
 0x1ac   : > { %v854_v18 = vsel %vm849_vm3, %v848_v17, 0 }
 0x1ad   : > { %2065 = vmatpush3.bf16.xpose.msra.mxu1 %v854_v18  ;;  %v960_v21 = vpop.permute.xlu1 %959 }
 0x1ae   : > { %2076 = vmatprep.subr.bf16.mxu1 %v2446_v4 }
 0x1af   : > { %v962_v19 = vpop.permute.xlu0 %961 }
 0x1b0   : > { %v967_v20 = vsel %vm849_vm3, %v962_v19, 0 }
 0x1b4   : > { %2067 = vmatmul.mubr.msk.bf16.vlgmr.msra.gmra.mxu1 %vm849_vm3, %v2754_v15 }
 0x1b5   : > { %2077 = vmatpush3.bf16.xpose.msra.mxu1 %v967_v20  ;;  %2078 = vmatprep.mubr.msk.bf16.mxu1 %vm2447_vm1, %v2446_v4 }
 0x1b6   : > { %2088 = vmatprep.subr.bf16.mxu1 %v2446_v4 }
 0x1bc   : > { %2079 = vmatmul.mubr.msk.bf16.vlgmr.msra.gmra.mxu1 %vm849_vm3, %v960_v21 }
 0x1bd   : > { %2090 = vmatprep.mubr.msk.bf16.mxu1 %vm2447_vm1, %v2446_v4  ;;  %2089 = vmatpush3.bf16.msra.mxu1 %v1074_v63 }
 0x1be   : > { %2100 = vmatprep.subr.bf16.mxu1 %v2446_v4 }
 0x274   : > { %v890_v26 = vpop.f32.mrf.mxu1 }
 0x275   : > { %v891_v27 = vadd.f32 %v890_v26, %v2771_v25 }
 0x276   : > { %v2068_v28 = vpop.f32.mrf.mxu1 }
 0x277   : > { %v896_v29 = vsel %vm849_vm3, %v891_v27, -inf }
 0x278   : > { %897 = vmax.xlane.f32.xlu1 %v896_v29  ;;  %v893_v30 = vpop.f32.mrf.mxu1 }
 0x27a   : > { %v2069_v31 = vpop.f32.mrf.mxu1 }
 0x27c   : > { %v1003_v32 = vpop.f32.mrf.mxu1 }
 0x27d   : > { %v1004_v33 = vadd.f32 %v1003_v32, %v2771_v25 }
 0x27e   : > { %v2080_v34 = vpop.f32.mrf.mxu1 }
 0x27f   : > { %v1009_v35 = vsel %vm849_vm3, %v1004_v33, -inf }
 0x280   : > { %1010 = vmax.xlane.f32.xlu0 %v1009_v35  ;;  %v1006_v36 = vpop.f32.mrf.mxu1 }
 0x282   : > { %v2081_v37 = vpop.f32.mrf.mxu1 }
 0x301   : > { %v898_v38 = vpop.xlane.xlu1 %897 }
 0x302   : > { %v899_v39 = vsub.f32 %v891_v27, %v898_v38 }
 0x304   : > { %v900_v40 = vmul.f32 1.442695, %v899_v39 }
 0x306   : > { %2266 = vpow2.f32 %v900_v40 }
 0x309   : > { %v1011_v41 = vpop.xlane.xlu0 %1010 }
 0x30a   : > { %v1012_v42 = vsub.f32 %v1004_v33, %v1011_v41 }
 0x30c   : > { %v1013_v43 = vmul.f32 1.442695, %v1012_v42 }
 0x30e   : > { %2268 = vpow2.f32 %v1013_v43 }
 0x313   : > { %v2267_v44 = vpop.eup %2266 }
 0x314   : > { %v902_v45 = vsel %vm849_vm3, %v2267_v44, 0.0 }
 0x315   : > { %903 = vadd.xlane.f32.xlu0 %v902_v45 }
 0x31b   : > { %v2269_v46 = vpop.eup %2268 }
 0x31c   : > { %v1015_v47 = vsel %vm849_vm3, %v2269_v46, 0.0 }
 0x31d   : > { %1016 = vadd.xlane.f32.xlu1 %v1015_v47 }
 0x32b   : > { %908 = vrot.lane.b32.xlu0 %v2752_v13, %s2451_s21 }
 0x32e   : > { %1021 = vrot.lane.b32.xlu1 %v2752_v13, %s2452_s17 }
 0x32f   : > { %1162 = vrot.lane.b32.xlu0 %v2754_v15, %s2453_s20 }
 0x332   : > { %1164 = vrot.lane.b32.xlu1 %v2752_v13, %s2454_s15 }
 0x39e   : > { %v904_v48 = vpop.xlane.xlu0 %903 }
 0x39f   : > { %2270 = vrcp.f32 %v904_v48 }
 0x3a2   : > { %v909_v49 = vpop.permute.xlu0 %908 }
 0x3a3   : > { %v915_v50 = vsel %vm913_vm5, %v909_v49, 0 }
 0x3a4   : > { %2071 = vmatpush3.bf16.msra.mxu0 %v915_v50 }
 0x3a5   : > { %2082 = vmatprep.subr.bf16.mxu0 %v2446_v4 }
 0x3a6   : > { %v1017_v51 = vpop.xlane.xlu1 %1016  ;;  %v1163_v16 = vpop.permute.xlu0 %1162 }
 0x3a7   : > { %2272 = vrcp.f32 %v1017_v51 }
 0x3aa   : > { %v1022_v54 = vpop.permute.xlu1 %1021 }
 0x3ab   : > { %v1027_v56 = vsel %vm913_vm5, %v1022_v54, 0 }
 0x3ac   : > { %v2271_v52 = vpop.eup %2270 }
 0x3ad   : > { %v906_v53 = vmul.f32 %v2271_v52, %v2267_v44 }
 0x3ae   : > { %v1165_v7 = vpop.permute.xlu1 %1164 }
 0x3af   : > { %v907_v55 = vpack.c.bf16 %v906_v53, %v906_v53  ;;  %v1170_v11 = vsel %vm849_vm3, %v1165_v7, 0 }
 0x3b1   : > { %2073 = vmatmul.mubr.msk.bf16.vlgmr.msra.gmra.mxu0 %vm849_vm3, %v907_v55 }
 0x3b2   : > { %2083 = vmatpush3.bf16.msra.mxu0 %v1027_v56  ;;  %2084 = vmatprep.mubr.msk.bf16.mxu0 %vm2447_vm1, %v2446_v4 }
 0x3b3   : > { %2094 = vmatprep.subr.bf16.mxu0 %v2446_v4 }
 0x3b4   : > { %v2273_v57 = vpop.eup %2272 }
 0x3b5   : > { %v1019_v58 = vmul.f32 %v2273_v57, %v2269_v46  ;;  %v842_v46 = vld [vmem:[%s2688_s14 + $0x8] sm:$0xf] }
 0x3b6   : > { %v1277_v47 = vsel %vm913_vm5, %v842_v46, 0 }
 0x3b7   : > { %v1020_v59 = vpack.c.bf16 %v1019_v58, %v1019_v58 }
 0x3b9   : > { %2085 = vmatmul.mubr.msk.bf16.vlgmr.msra.gmra.mxu0 %vm849_vm3, %v1020_v59 }
 0x3ba   : > { %2096 = vmatprep.mubr.msk.bf16.mxu0 %vm2447_vm1, %v2446_v4  ;;  %2095 = vmatpush3.bf16.msra.mxu0 %v1120_v61 }
 0x3bb   : > { %2106 = vmatprep.subr.bf16.mxu0 %v2446_v4 }
 0x471   : > { %v951_v0 = vpop.f32.mrf.mxu0 }
 0x472   : > { %v957_v1 = vpack.c.bf16 %v951_v0, %v951_v0 }
 0x473   : > { %v2074_v2 = vpop.f32.mrf.mxu0 }
 0x474   : > { %2097 = vmatmul.mubr.msk.bf16.vlgmr.msra.gmra.mxu0 %vm849_vm3, %v957_v1 }
 0x475   : > { %v954_v3 = vpop.f32.mrf.mxu0  ;;  %2108 = vmatprep.mubr.msk.bf16.mxu0 %vm2447_vm1, %v2446_v4 }
 0x477   : > { %v2075_v5 = vpop.f32.mrf.mxu0 }
 0x478   : > { %v843_v5 = vld [vmem:[%s2688_s14 + $0xc] sm:$0xf]  ;;  %s3042_s14 = sld [smem:[#allocation36_spill]] (!%p2010_p4) }
 0x479   : > { %v1063_v8 = vpop.f32.mrf.mxu0 }
 0x47a   : > { %v1069_v9 = vpack.c.bf16 %v1063_v8, %v1063_v8 }
 0x47b   : > { %v2086_v10 = vpop.f32.mrf.mxu0 }
 0x47c   : > { %2091 = vmatmul.mubr.msk.bf16.vlgmr.msra.gmra.mxu1 %vm849_vm3, %v1069_v9 }
 0x47d   : > { %2101 = vmatpush3.bf16.xpose.msra.mxu1 %v1170_v11  ;;  %v1066_v12 = vpop.f32.mrf.mxu0  ;;  %2102 = vmatprep.mubr.msk.bf16.mxu1 %vm2447_vm1, %v2446_v4 }
 0x47e   : > { %2112 = vmatprep.subr.bf16.mxu1 %v2446_v4 }
 0x47f   : > { %v2087_v14 = vpop.f32.mrf.mxu0 }
 0x484   : > { %2103 = vmatmul.mubr.msk.bf16.vlgmr.msra.gmra.mxu1 %vm849_vm3, %v1163_v16 }
 0x485   : > { %2114 = vmatprep.mubr.msk.bf16.mxu1 %vm2447_vm1, %v2446_v4  ;;  %2113 = vmatpush3.bf16.msra.mxu1 %v1277_v47  ;;  %v2264_v47 = vld [vmem:[%s2715_s28 + $0x8] sm:$0xff]  }
 0x486   : > { %2124 = vmatprep.subr.bf16.mxu1 %v2446_v4 }
 0x534   : > { %v1156_v17 = vpop.f32.mrf.mxu0 }
 0x536   : > { %v2098_v18 = vpop.f32.mrf.mxu0 }
 0x538   : > { %v1159_v19 = vpop.f32.mrf.mxu0 }
 0x53a   : > { %v2099_v20 = vpop.f32.mrf.mxu0 }
 0x53c   : > { %v1110_v21 = vpop.f32.mrf.mxu1 }
 0x53d   : > { %v2810_v22 = vadd.f32 %v1156_v17, %v1110_v21  ;;  %v1995_v21 = vld [vmem:[%s3034_s12] ss:$0 sm:$0xff] }
 0x53e   : > { %v2092_v23 = vpop.f32.mrf.mxu1 }
 0x540   : > { %v1113_v24 = vpop.f32.mrf.mxu1 }
 0x542   : > { %v2093_v26 = vpop.f32.mrf.mxu1 }
 0x544   : > { %v1206_v27 = vpop.f32.mrf.mxu1 }
 0x545   : > { %v1207_v28 = vadd.f32 %v1206_v27, %v2771_v25 }
 0x546   : > { %v2104_v29 = vpop.f32.mrf.mxu1 }
 0x547   : > { %v1212_v30 = vsel %vm849_vm3, %v1207_v28, -inf }
 0x548   : > { %1213 = vmax.xlane.f32.xlu1 %v1212_v30  ;;  %v1209_v31 = vpop.f32.mrf.mxu1 }
 0x54a   : > { %v2105_v32 = vpop.f32.mrf.mxu1 }
 0x559   : > { %1322 = vrot.lane.b32.xlu1 %v2752_v13, %s2455_s13 }
 0x55d   : > { %1320 = vrot.lane.b32.xlu1 %v2754_v15, %s2456_s29 }
 0x5d1   : > { %v1214_v33 = vpop.xlane.xlu1 %1213 }
 0x5d2   : > { %v1215_v34 = vsub.f32 %v1207_v28, %v1214_v33 }
 0x5d4   : > { %v1216_v35 = vmul.f32 1.442695, %v1215_v34 }
 0x5d5   : > { %v1323_v42 = vpop.permute.xlu1 %1322 }
 0x5d6   : > { %2274 = vpow2.f32 %v1216_v35  ;;  %v1328_v44 = vsel %vm849_vm3, %v1323_v42, 0  ;;  %v2260_v35 = vld [vmem:[%s2705_s19 + $0x8] sm:$0xff]  }
 0x5d9   : > { %v1321_v45 = vpop.permute.xlu1 %1320 }
 0x5e3   : > { %v2275_v36 = vpop.eup %2274 }
 0x5e4   : > { %v1218_v37 = vsel %vm849_vm3, %v2275_v36, 0.0 }
 0x5e5   : > { %1219 = vadd.xlane.f32.xlu0 %v1218_v37  ;;  %v2263_v37 = vld [vmem:[%s2715_s28 + $0x10] sm:$0xff]  }
 0x5fb   : > { %1224 = vrot.lane.b32.xlu0 %v2752_v13, %s2457_s11 }
 0x66e   : > { %v1220_v38 = vpop.xlane.xlu0 %1219 }
 0x66f   : > { %2276 = vrcp.f32 %v1220_v38 }
 0x672   : > { %v1225_v39 = vpop.permute.xlu0 %1224 }
 0x673   : > { %v1230_v40 = vsel %vm913_vm5, %v1225_v39, 0 }
 0x674   : > { %2107 = vmatpush3.bf16.msra.mxu0 %v1230_v40 }
 0x675   : > { %2118 = vmatprep.subr.bf16.mxu0 %v2446_v4 }
 0x67c   : > { %v2277_v15 = vpop.eup %2276 }
 0x67d   : > { %v1222_v41 = vmul.f32 %v2277_v15, %v2275_v36  ;;  %v2261_v36 = vld [vmem:[%s2705_s19] sm:$0xff]  }
 0x67f   : > { %v1223_v43 = vpack.c.bf16 %v1222_v41, %v1222_v41  ;;  %v1996_v41 = vld [vmem:[%s3035_s4] ss:$0 sm:$0xff] }
 0x681   : > { %2109 = vmatmul.mubr.msk.bf16.vlgmr.msra.gmra.mxu0 %vm849_vm3, %v1223_v43  ;;  %v1997_v43 = vld [vmem:[%s3037_s26] ss:$0 sm:$0xff] }
 0x682   : > { %2119 = vmatpush3.bf16.xpose.msra.mxu0 %v1328_v44  ;;  %2120 = vmatprep.mubr.msk.bf16.mxu0 %vm2447_vm1, %v2446_v4 }
 0x683   : > { %2130 = vmatprep.subr.bf16.mxu0 %v2446_v4 }
 0x689   : > { %2121 = vmatmul.mubr.msk.bf16.vlgmr.msra.gmra.mxu0 %vm849_vm3, %v1321_v45 }
 0x68a   : > { %2132 = vmatprep.mubr.msk.bf16.mxu0 %vm2447_vm1, %v2446_v4 }
 0x741   : > { %v1266_v48 = vpop.f32.mrf.mxu0 }
 0x742   : > { %v1272_v49 = vpack.c.bf16 %v1266_v48, %v1266_v48  ;;  %v2265_v48 = vld [vmem:[%s2715_s28] sm:$0xff]  }
 0x743   : > { %v2110_v50 = vpop.f32.mrf.mxu0 }
 0x744   : > { %2115 = vmatmul.mubr.msk.bf16.vlgmr.msra.gmra.mxu1 %vm849_vm3, %v1272_v49  ;;  %v1998_v49 = vld [vmem:[%s739_s2] ss:$0 sm:$0xff] }
 0x745   : > { %v1269_v51 = vpop.f32.mrf.mxu0  ;;  %2126 = vmatprep.mubr.msk.bf16.mxu1 %vm2447_vm1, %v2446_v4 }
 0x747   : > { %v2111_v52 = vpop.f32.mrf.mxu0 }
 0x749   : > { %v1364_v53 = vpop.f32.mrf.mxu0 }
 0x74a   : > { %v1365_v54 = vadd.f32 %v1364_v53, %v2771_v25 }
 0x74b   : > { %v2122_v55 = vpop.f32.mrf.mxu0 }
 0x74c   : > { %v1370_v56 = vsel %vm849_vm3, %v1365_v54, -inf }
 0x74d   : > { %1371 = vmax.xlane.f32.xlu0 %v1370_v56  ;;  %v1367_v57 = vpop.f32.mrf.mxu0 }
 0x74f   : > { %v2123_v58 = vpop.f32.mrf.mxu0 }
 0x763   : > { %1382 = vrot.lane.b32.xlu0 %v2752_v13, %s2458_s27  ;;  %v1435_v13 = vsel %vm913_vm5, %v843_v5, 0 }
 0x764   : > { %2131 = vmatpush3.bf16.msra.mxu0 %v1435_v13 }
 0x765   : > { %2144 = vmatprep.subr.bf16.mxu0 %v2446_v4 }
 0x7d6   : > { %v1372_v59 = vpop.xlane.xlu0 %1371 }
 0x7d7   : > { %v1373_v60 = vsub.f32 %v1365_v54, %v1372_v59 }
 0x7d9   : > { %v1374_v61 = vmul.f32 1.442695, %v1373_v60 }
 0x7da   : > { %v1383_v62 = vpop.permute.xlu0 %1382 }
 0x7db   : > { %2278 = vpow2.f32 %v1374_v61  ;;  %v1388_v63 = vsel %vm913_vm5, %v1383_v62, 0 }
 0x7dc   : > { %2125 = vmatpush3.bf16.msra.mxu1 %v1388_v63 }
 0x7dd   : > { %2136 = vmatprep.subr.bf16.mxu1 %v2446_v4 }
 0x7e8   : > { %v2279_v25 = vpop.eup %2278 }
 0x7e9   : > { %v1376_v0 = vsel %vm849_vm3, %v2279_v25, 0.0 }
 0x7ea   : > { %1377 = vadd.xlane.f32.xlu1 %v1376_v0 }
 0x804   : > { %v1313_v1 = vpop.f32.mrf.mxu1 }
 0x805   : > { %v1319_v2 = vadd.f32 %v1313_v1, %v2810_v22 }
 0x806   : > { %v2116_v3 = vpop.f32.mrf.mxu1 }
 0x808   : > { %v1316_v7 = vpop.f32.mrf.mxu1 }
 0x80a   : > { %v2117_v8 = vpop.f32.mrf.mxu1 }
 0x873   : > { %v1378_v9 = vpop.xlane.xlu1 %1377 }
 0x874   : > { %2280 = vrcp.f32 %v1378_v9  ;;  %v2008_v9 = vld [vmem:[%s750_s0] ss:$0 sm:$0xff] }
 0x881   : > { %v2281_v10 = vpop.eup %2280 }
 0x882   : > { %v1380_v11 = vmul.f32 %v2281_v10, %v2279_v25 }
 0x884   : > { %v1381_v12 = vpack.c.bf16 %v1380_v11, %v1380_v11  ;;  %v2009_v11 = vld [vmem:[%s753_s7] ss:$0 sm:$0xff] }
 0x886   : > { %2127 = vmatmul.mubr.msk.bf16.vlgmr.msra.gmra.mxu1 %vm849_vm3, %v1381_v12 }
 0x887   : > { %2140 = vmatprep.mubr.msk.bf16.mxu1 %vm2447_vm1, %v2446_v4  ;;  %2137 = vmatpush3.bf16.msra.mxu1 %v2260_v35 }
 0x888   : > { %2138 = vmatprep.subr.bf16.mxu1 %v2446_v4 }
 0x88b   : > { %2139 = vmatpush3.bf16.msra.mxu1 %v2261_v36 }
 0x946   : > { %v1424_v14 = vpop.f32.mrf.mxu1 }
 0x947   : > { %v1430_v16 = vpack.c.bf16 %v1424_v14, %v1424_v14 }
 0x948   : > { %v2128_v17 = vpop.f32.mrf.mxu1 }
 0x949   : > { %2133 = vmatmul.mubr.msk.bf16.vlgmr.msra.gmra.mxu0 %vm849_vm3, %v1430_v16 }
 0x94a   : > { %v1427_v18 = vpop.f32.mrf.mxu1  ;;  %2152 = vmatprep.mubr.msk.bf16.mxu0 %vm2447_vm1, %v2446_v4 }
 0x94c   : > { %v2129_v19 = vpop.f32.mrf.mxu1 }
 0xa09   : > { %v1471_v20 = vpop.f32.mrf.mxu0 }
 0xa0a   : > { %v1477_v22 = vadd.f32 %v1471_v20, %v1319_v2 }
 0xa0b   : > { %v2134_v23 = vpop.f32.mrf.mxu0 }
 0xa0c   : > { %v1485_v24 = vadd.f32 %v1995_v21, %v1477_v22 }
 0xa0d   : > { %v1474_v26 = vpop.f32.mrf.mxu0 }
 0xa0e   : > { %v1486_v27 = vadd.f32 %v1485_v24, %v2736_v6  ;;  %v2262_v6 = vld [vmem:[%s2715_s28 + $0x18] sm:$0xff]  }
 0xa0f   : > { %v2135_v28 = vpop.f32.mrf.mxu0  ;;  %2145 = vmatpush3.bf16.msra.mxu0 %v2262_v6 }
 0xa10   : > { %v1489_v29 = vsel %vm789_vm2, %v1486_v27, 0.0  ;;  %2146 = vmatprep.subr.bf16.mxu0 %v2446_v4 }
 0xa11   : > { %1490 = vadd.xlane.f32.xlu1 %v1489_v29 }
 0xa13   : > { %2147 = vmatpush3.bf16.msra.mxu0 %v2263_v37 }
 0xa14   : > { %2148 = vmatprep.subr.bf16.mxu0 %v2446_v4 }
 0xa17   : > { %2149 = vmatpush3.bf16.msra.mxu0 %v2264_v47 }
 0xa18   : > { %2150 = vmatprep.subr.bf16.mxu0 %v2446_v4  ;;  %v2002_v4 = vld [vmem:[%s747_s22] ss:$0 sm:$0xff] }
 0xa1b   : > { %2151 = vmatpush3.bf16.msra.mxu0 %v2265_v48 }
 0xa9a   : > { %v1491_v30 = vpop.xlane.xlu1 %1490 }
 0xa9b   : > { %v1493_v31 = vmul.f32 0.03125, %v1491_v30 }
 0xa9d   : > { %v1494_v32 = vsub.f32 %v1486_v27, %v1493_v31 }
 0xa9f   : > { %v1495_v33 = vmul.f32 %v1494_v32, %v1494_v32 }
 0xaa1   : > { %v1496_v34 = vsel %vm789_vm2, %v1495_v33, 0.0 }
 0xaa2   : > { %1497 = vadd.xlane.f32.xlu1 %v1496_v34 }
 0xb2b   : > { %v1498_v38 = vpop.xlane.xlu1 %1497 }
 0xb2c   : > { %v1499_v39 = vmul.f32 0.03125, %v1498_v38 }
 0xb2e   : > { %v1500_v40 = vadd.f32 1e-05, %v1499_v39 }
 0xb30   : > { %2282 = vrsqrt.f32 %v1500_v40 }
 0xb3d   : > { %v2283_v15 = vpop.eup %2282 }
 0xb3e   : > { %v1502_v42 = vmul.f32 %v2283_v15, %v1494_v32 }
 0xb40   : > { %v1509_v44 = vmul.f32 %v1996_v41, %v1502_v42 }
 0xb42   : > { %v1516_v45 = vadd.f32 %v1997_v43, %v1509_v44 }
 0xb44   : > { %v1517_v46 = vpack.c.bf16 %v1516_v45, %v1516_v45 }
 0xb46   : > { %2141 = vmatmul.mubr.msk.bf16.vlgmr.msra.gmra.mxu1 %vm789_vm2, %v1517_v46 }
 0xc06   : > { %v1578_v50 = vpop.f32.mrf.mxu1 }
 0xc07   : > { %v1579_v51 = vadd.f32 %v1998_v49, %v1578_v50 }
 0xc08   : > { %v2142_v52 = vpop.f32.mrf.mxu1 }
 0xc09   : > { %v1584_v53 = vmax.f32 %v1579_v51, 0.0 }
 0xc0a   : > { %v1581_v54 = vpop.f32.mrf.mxu1 }
 0xc0b   : > { %v1585_v55 = vpack.c.bf16 %v1584_v53, %v1584_v53 }
 0xc0c   : > { %v2143_v56 = vpop.f32.mrf.mxu1 }
 0xc0d   : > { %2153 = vmatmul.mubr.msk.bf16.vlgmr.msra.gmra.mxu0 %vm1625_vm6, %v1585_v55 }
 0xccd   : > { %v1663_v57 = vpop.f32.mrf.mxu0 }
 0xcce   : > { %v1664_v58 = vadd.f32 %v2002_v4, %v1663_v57 }
 0xccf   : > { %v2154_v59 = vpop.f32.mrf.mxu0 }
 0xcd0   : > { %v1669_v60 = vadd.f32 %v1664_v58, %v1516_v45 }
 0xcd1   : > { %v1666_v61 = vpop.f32.mrf.mxu0 }
 0xcd2   : > { %v1672_v62 = vsel %vm789_vm2, %v1669_v60, 0.0 }
 0xcd3   : > { %1673 = vadd.xlane.f32.xlu1 %v1672_v62  ;;  %v2155_v63 = vpop.f32.mrf.mxu0 }
 0xd5c   : > { %v1674_v25 = vpop.xlane.xlu1 %1673 }
 0xd5d   : > { %v1675_v0 = vmul.f32 0.03125, %v1674_v25 }
 0xd5f   : > { %v1676_v1 = vsub.f32 %v1669_v60, %v1675_v0 }
 0xd61   : > { %v1677_v2 = vmul.f32 %v1676_v1, %v1676_v1 }
 0xd63   : > { %v1678_v3 = vsel %vm789_vm2, %v1677_v2, 0.0 }
 0xd64   : > { %1679 = vadd.xlane.f32.xlu1 %v1678_v3 }
 0xded   : > { %v1680_v5 = vpop.xlane.xlu1 %1679 }
 0xdee   : > { %v1681_v13 = vmul.f32 0.03125, %v1680_v5 }
 0xdf0   : > { %v1682_v7 = vadd.f32 1e-05, %v1681_v13 }
 0xdf2   : > { %2284 = vrsqrt.f32 %v1682_v7 }
 0xdff   : > { %v2285_v8 = vpop.eup %2284 }
 0xe00   : > { %v1684_v10 = vmul.f32 %v2285_v8, %v1676_v1 }
 0xe02   : > { %v1691_v12 = vmul.f32 %v2008_v9, %v1684_v10  ;;  %1703 = sbr.rel (%p2010_p4) target bundleno = 3900 (0xf3c), region = 100 }
 0xe04   : > { %v1698_v14 = vadd.f32 %v2009_v11, %v1691_v12 }
 0xe06   : > { %1699 = vst.msk [vmem:[#allocation2] sm:$0xff] %vm789_vm2, %v1698_v14 }
 0xe07   : > { %v1706_v16 = vsel %vm789_vm2, %v1698_v14, 0.0  ;;  %v2011_v27 = vld [vmem:[%s3041_s24] ss:$0 sm:$0xff] }
 0xe08   : > { %1707 = vadd.xlane.f32.xlu0 %v1706_v16  ;;  %v2012_v29 = vld [vmem:[%s3042_s14] ss:$0 sm:$0xff] }
 0xe91   : > { %v1708_v17 = vpop.xlane.xlu0 %1707 }
 0xe92   : > { %v1709_v18 = vmul.f32 0.03125, %v1708_v17 }
 0xe94   : > { %v1710_v19 = vsub.f32 %v1698_v14, %v1709_v18 }
 0xe96   : > { %v1711_v20 = vmul.f32 %v1710_v19, %v1710_v19 }
 0xe98   : > { %v1712_v21 = vsel %vm789_vm2, %v1711_v20, 0.0 }
 0xe99   : > { %1713 = vadd.xlane.f32.xlu0 %v1712_v21 }
 0xf22   : > { %v1714_v22 = vpop.xlane.xlu0 %1713 }
 0xf23   : > { %v1715_v23 = vmul.f32 0.03125, %v1714_v22 }
 0xf25   : > { %v1716_v24 = vadd.f32 1e-05, %v1715_v23 }
 0xf27   : > { %2286 = vrsqrt.f32 %v1716_v24 }
 0xf34   : > { %v2287_v26 = vpop.eup %2286 }
 0xf35   : > { %v1718_v28 = vmul.f32 %v2287_v26, %v1710_v19 }
 0xf37   : > { %v1725_v30 = vmul.f32 %v2011_v27, %v1718_v28 }
 0xf39   : > { %v1732_v31 = vadd.f32 %v2012_v29, %v1725_v30 }
 0xf3b   : > { %1733 = vst.msk [vmem:[%s2729_s1] sm:$0xff] %vm789_vm2, %v1732_v31 }
 0xf3c PF: > { %s3043_s18 = sld [smem:[#allocation15_spill]]  ;;  %s1748_s30 = sshll.u32 %s2729_s1, 4  ;;  %s1749_s30 = int_to_ptr.vmem [resolvable:$true] %s1748_s30 }
 0xf3d   : > { %s3044_s12 = sld [smem:[#allocation24_spill]]  ;;  %s2342_s17 = scalar_lea.vmem %s1749_s30, 128 }
 0xf3e   : > { %s3045_s19 = sld [smem:[#allocation21_spill]]  ;;  %p2343_p12 = scmp.ne.s32.totalorder %s1749_s30, %s2342_s17 }
 0xf3f   : > { %s3046_s23 = sld [smem:[#allocation37_spill]]  ;;  %s2459_s20 = smov [#allocation8]  }
 0xf40   : > { %s2346_s15 = sshll.u32 %s2459_s20, 4  ;;  %s2347_s15 = int_to_ptr.vmem [resolvable:$false] %s2346_s15 }
 0xf41   : > { %s2348_s2 = scalar_lea.vmem %s2347_s15, 256  ;;  %p2349_p5 = scmp.lt.s32.totalorder %s1749_s30, %s2347_s15 }
 0xf42   : > { %s2014_s25 = sshll.u32 %s3043_s18, 7  ;;  %p2350_p7 = scmp.lt.s32.totalorder %s2348_s2, %s2342_s17 }
 0xf43   : > { %s1735_s21 = scalar_lea.sflag [#allocation5], %s3044_s12 }
 0xf44   : > { %p3048_p0 = scmp.ne.s32.totalorder %s3045_s19, 0  ;;  %p2351_p9 = por %p2350_p7, %p2349_p5 }
 0xf45   : > { %s3047_s16 = smov %s3046_s23  ;;  %s1746_s26 = scalar_lea.hbm %s3046_s23, %s2014_s25 }
 0xf46   : > { %p2344_p3 = pnand %p2343_p12, %p3048_p0 }
 0xf48   : > { %p2345_p2 = pneg %p2344_p3 }
 0xf4a   : > { %p2352_p6 = pnand %p2351_p9, %p2345_p2 }
 0xf4c   : > { %2355 = shalt.err (!%p2352_p6)
}
 0xf4d   : > { %s2356_s28 = scalar_lea.hbm %s1746_s26, 128  ;;  %s2360_s13 = scalar_lea.hbm %s3047_s16, 256 }
 0xf4e   : > { %p2357_p11 = scmp.ne.s32.totalorder %s1746_s26, %s2356_s28  ;;  %p2361_p8 = scmp.lt.s32.totalorder %s1746_s26, %s3047_s16 }
 0xf4f   : > { %p2362_p1 = scmp.lt.s32.totalorder %s2360_s13, %s2356_s28 }
 0xf50   : > { %p2358_p13 = pnand %p2357_p11, %p3048_p0 }
 0xf51   : > { %p2363_p4 = por %p2362_p1, %p2361_p8 }
 0xf52   : > { %p2359_p10 = pneg %p2358_p13 }
 0xf54   : > { %p2364_p12 = pnand %p2363_p4, %p2359_p10 }
 0xf56   : > { %2367 = shalt.err (!%p2364_p12)
}
 0xf57   : > { %2162 = dma.vmem_to_hbm [thread:$0]  (%p3048_p0), %s1749_s30, 128, %s1746_s26, %s1735_s21  }
 0xf58 PF: > { %s3049_s7 = sld [smem:[#allocation18_spill]] }
 0xf59   : > { %s3050_s10 = sld [smem:[#allocation12_spill]] }
 0xf5a   : > { %s3051_s24 = sld [smem:[#allocation19_spill]] }
 0xf5e   : > { %p2179_p3 = scmp.ge.s32.totalorder %s3049_s7, 2 }
 0xf5f   : > { %s1760_s0 = sand.u32 1, %s3050_s10  }
 0xf60   : > { %p3052_p2 = scmp.ne.s32.totalorder %s3051_s24, 0  ;;  %s1761_s27 = scalar_lea.sflag [#allocation5], %s1760_s0 }
 0xf62   : > { %p2173_p5 = pnand %p2179_p3, %p3052_p2 }
 0xf64   : > { %p2174_p7 = pneg %p2173_p5 }
 0xf66   : > { %2409 = dma.done.wait (%p2174_p7), %s1761_s27, 128  }
 0xf67   : > { %2411 = vsyncadd (%p2174_p7), %s1761_s27, 4294967168  ;;  %s33_s28 = sadd.s32 1, %s3049_s7   ;;  %s3053_s21 = sld [smem:[#allocation13_spill]] }
 0xf68   : > { %p30_p9 = scmp.ge.s32.totalorder %s33_s28, 6   ;;  %s3054_s22 = sld [smem:[#allocation14_spill]] }
 0xf69   : > { %s3055_s23 = sld [smem:[#allocation23_spill]] }
 0xf6a   : > { %s3056_s24 = sld [smem:[#allocation16_spill]]  ;;  %32 = sbr.rel (!%p30_p9) target bundleno = 22 (0x16), region = 177 }
 0xf6b   : > { %s3057_s25 = sld [smem:[#allocation17_spill]] }
 0xf6c   : > { %s3058_s26 = sld [smem:[#allocation20_spill]] }
 0xf6d   : > { %s3059_s27 = sld [smem:[#allocation22_spill]] }
 0xf6f   :  { %1766 = vsyncpa [#allocation4], 1 }
 0xf70   :  { %1768 = vsyncpa [#allocation4 + $0x1], 1 }
 0xf71   :  { %1769 = vsyncpa [#allocation7], 1 }
 0xf72   :  { %1770 = vsyncpa [#allocation5], 1 }
 0xf73   :  { %1772 = vsyncpa [#allocation5 + $0x1], 1 }

</bundles_post_ra>
